<compile_context>
chip_gen: v5e
topology: v5e:2x2
jax: 0.10.0
libtpu: 0.0.40
codegen_flags: <defaults>
</compile_context>

<pallas_src>
import functools

import jax
import jax.numpy as jnp
from jax.experimental import pallas as pl
from jax.experimental.pallas import tpu as pltpu

_BN_EPS = 1e-5


def _fold_bn_2d(w, bias, bn, eps=_BN_EPS):
    """Fold eval-mode BatchNorm into a (Cout, Cin) conv weight / bias."""
    gamma, beta, mean, var = bn
    s = gamma / jnp.sqrt(var + eps)
    w_f = w * s[:, None]
    b_f = beta - s * mean
    if bias is not None:
        b_f = b_f + s * bias
    return w_f, b_f


def _make_fused_kernel(T, C, H, W):
    """Fused temporal-attention + 3x3/1x1 conv kernel (one temporal group / step)."""
    M = H * W
    taps = [(kh, kw) for kh in range(3) for kw in range(3)]
    f32 = jnp.float32

    def kernel(x_ref, mask_ref, w1_ref, b1_ref, w2_ref, b2_ref, wg_ref, bg_ref,
               wsp_ref, bsp_ref, wpt_ref, bpt_ref, o_ref, slab_ref):
        # x_ref : (1, T*C, M) channel-major pixels (pure view of NCHW), lane axis = M
        # o_ref : (1, T, Cout, M) -> reshapes to NCHW output with no transpose
        xr = x_ref[0].astype(f32)                                            # (T*C, M)

        # ---------------- stage 1: temporal attention + gating ----------------
        # 1x1 convs == channel-mixing matmuls (BN folded).  Kept in f32 (tiny).
        a1 = jnp.dot(w1_ref[...], xr, preferred_element_type=f32) + b1_ref[...]
        a1 = jnp.maximum(a1, 0.0)                                            # ReLU
        a2 = jnp.dot(w2_ref[...], a1, preferred_element_type=f32) + b2_ref[...]
        a2 = jax.nn.sigmoid(a2)                                              # (T, M)
        attn = a2 * pl.reciprocal(jnp.sum(a2, axis=0, keepdims=True), approx=False)
        ws = attn[0:1, :] * xr[0:C, :]
        for t in range(1, T):
            ws = ws + attn[t:t + 1, :] * xr[t * C:(t + 1) * C, :]            # (C, M)
        gate = jax.nn.sigmoid(
            jnp.dot(wg_ref[...], ws, preferred_element_type=f32) + bg_ref[...])  # (T, M)

        # --------- stage 2: 3x3 conv + BN + ReLU6 + 1x1 conv + BN ------------
        wsp = wsp_ref[...]           # (mid, 9C)  matmul dtype
        wpt = wpt_ref[...]           # (Cout, mid)
        bsp = bsp_ref[...]           # (mid, 1)   f32 (folded BN shift)
        bpt = bpt_ref[...]           # (Cout, 1)  f32

        # Halo columns of every tap window stay zero for all T frames, so the
        # slab is cleared once per grid step (scratch is per-core on megacore).
        slab_ref[...] = jnp.zeros(slab_ref.shape, slab_ref.dtype)

        for t in range(T):
            g = gate[t:t + 1, :]
            blend = g * xr[t * C:(t + 1) * C, :] + (1.0 - g) * ws            # (C, M)
            # Assemble the channel-major (9C, M) tap slab in VMEM:
            #   tap(kh,kw)[c, m] = blend[c, m + s],  s = (kh-1)*W + (kw-1),
            # zero where the source pixel crosses the image border (mask_ref).
            # Each write is a full-lane (C, L~M) row-block store.
            for idx, (kh, kw) in enumerate(taps):
                s = (kh - 1) * W + (kw - 1)
                d0 = max(0, -s)               # first valid destination column
                s0 = max(0, s)                # matching source column (s0 = d0 + s)
                L = M - abs(s)
                vals = blend[:, s0:s0 + L] * mask_ref[idx:idx + 1, d0:d0 + L]
                slab_ref[idx * C:(idx + 1) * C, d0:d0 + L] = vals.astype(slab_ref.dtype)
            # Single K = 9*C MXU contraction, lane-dense (rows, M) results.
            h = jnp.dot(wsp, slab_ref[...], preferred_element_type=f32) + bsp
            h = jnp.minimum(jnp.maximum(h, 0.0), 6.0)                        # ReLU6
            y = jnp.dot(wpt, h.astype(wpt.dtype), preferred_element_type=f32) + bpt
            o_ref[0, t] = y.astype(o_ref.dtype)                              # NCHW store

    return kernel


def ti_fused_mbconv_forward(x, params, *, time_steps, matmul_dtype=jnp.bfloat16):
    """TiFusedMBConv forward. x: (B*T, C, H, W) -> (B*T, Cout, H, W)."""
    B_T, C, H, W = x.shape
    T = time_steps
    assert B_T % T == 0
    B = B_T // T
    TC, M = T * C, H * W
    mid = params["spatial_w"].shape[0]
    Cout = params["point_w"].shape[0]
    f32 = jnp.float32

    # ---- fold eval-mode BatchNorms into the adjacent convs (parameter math) ----
    w1, b1 = _fold_bn_2d(params["attn_w1"], params["attn_b1"], params["attn_bn1"])  # (C, TC)
    w2, b2 = _fold_bn_2d(params["attn_w2"], params["attn_b2"], params["attn_bn2"])  # (T, C)
    wg = params["gate_w"].astype(f32)                                                # (T, C)
    bg = params["gate_b"].astype(f32)

    g_s, be_s, m_s, v_s = params["spatial_bn"]
    s_sp = g_s / jnp.sqrt(v_s + _BN_EPS)
    w_sp = params["spatial_w"] * s_sp[:, None, None, None]           # (mid, C, 3, 3) BN-folded
    sh_sp = be_s - s_sp * m_s                                        # (mid,)
    w_pt, sh_pt = _fold_bn_2d(params["point_w"], None, params["point_bn"])  # (Cout, mid)

    # Stage-2 contraction matrices, channel-major ("transposed") so every MXU
    # result has lane axis = M:  h^T = w_sp_T @ slab,  y^T = w_pt_T @ h^T.
    w_sp_T = jnp.transpose(w_sp, (0, 2, 3, 1)).reshape(mid, 9 * C).astype(matmul_dtype)
    w_pt_T = w_pt.astype(matmul_dtype)                               # (Cout, mid)

    # Per-tap border validity masks (host constants), shape (9, M).
    hh = jnp.arange(H)[:, None]
    ww = jnp.arange(W)[None, :]
    masks = []
    for kh in range(3):
        for kw in range(3):
            dh, dw = kh - 1, kw - 1
            ok = (hh + dh >= 0) & (hh + dh < H) & (ww + dw >= 0) & (ww + dw < W)
            masks.append(ok.reshape(M))
    tap_mask = jnp.stack(masks).astype(f32)                          # (9, M)

    x_cm = x.reshape(B, TC, M)      # pure view of NCHW -- the only activation read

    kernel = _make_fused_kernel(T, C, H, W)

    # ---- VMEM budget from the actual per-step footprint, clamped to capacity ----
    it_mm = jnp.dtype(matmul_dtype).itemsize
    it_x = jnp.dtype(x.dtype).itemsize
    fp = 2 * TC * M * it_x                                   # input block (double-buffered)
    fp += 2 * T * Cout * M * it_x                            # output block (double-buffered)
    fp += 9 * C * M * it_mm                                  # tap slab scratch
    fp += 2 * (9 * M + C * TC + 2 * T * C + C + 2 * T) * 4   # masks + stage-1 weights/biases
    fp += 2 * (mid * 9 * C + Cout * mid) * it_mm + 2 * (mid + Cout) * 4
    fp += (3 * C + 4 * T + mid + Cout) * M * 4               # live f32 temporaries (estimate)
    vmem_limit = max(32 * 1024 * 1024, min(2 * fp, 100 * 1024 * 1024))
    try:
        cap = pltpu.get_tpu_info().vmem_capacity_bytes
        vmem_limit = min(vmem_limit, int(0.85 * cap))
    except Exception:
        vmem_limit = min(vmem_limit, 56 * 1024 * 1024)       # safe for v7x's 64 MiB

    # TODO(synk): for very large H*W (56^2..112^2 at C>=96) tile M into row
    # strips with a 2-row halo (overlapping blocks / manual DMA), and use
    # pl.Buffered(1) on the constant weight blocks if VMEM stays tight on v7x.
    out = pl.pallas_call(
        kernel,
        out_shape=jax.ShapeDtypeStruct((B, T, Cout, M), x.dtype),
        grid=(B,),
        in_specs=[
            pl.BlockSpec((1, TC, M), lambda b: (b, 0, 0)),           # x (channel-major view)
            pl.BlockSpec((9, M), lambda b: (0, 0)),                  # per-tap border masks
            pl.BlockSpec((C, TC), lambda b: (0, 0)),                 # attn conv1 (BN folded)
            pl.BlockSpec((C, 1), lambda b: (0, 0)),
            pl.BlockSpec((T, C), lambda b: (0, 0)),                  # attn conv2 (BN folded)
            pl.BlockSpec((T, 1), lambda b: (0, 0)),
            pl.BlockSpec((T, C), lambda b: (0, 0)),                  # gate conv
            pl.BlockSpec((T, 1), lambda b: (0, 0)),
            pl.BlockSpec((mid, 9 * C), lambda b: (0, 0)),            # spatial conv (K = 9C)
            pl.BlockSpec((mid, 1), lambda b: (0, 0)),
            pl.BlockSpec((Cout, mid), lambda b: (0, 0)),             # point conv
            pl.BlockSpec((Cout, 1), lambda b: (0, 0)),
        ],
        out_specs=pl.BlockSpec((1, T, Cout, M), lambda b: (b, 0, 0, 0)),
        scratch_shapes=[pltpu.VMEM((9 * C, M), matmul_dtype)],
        compiler_params=pltpu.CompilerParams(
            dimension_semantics=("parallel",),
            vmem_limit_bytes=int(vmem_limit),
        ),
    )(x_cm, tap_mask, w1, b1[:, None], w2, b2[:, None], wg, bg[:, None],
      w_sp_T, sh_sp[:, None], w_pt_T, sh_pt[:, None])

    return out.reshape(B_T, Cout, H, W)                      # pure view, no transpose


# ----------------------------- pure-JAX reference -----------------------------
def _sigmoid(v):
    return 1.0 / (1.0 + jnp.exp(-v))


def _bn_nchw(x, bn, eps=_BN_EPS):
    gamma, beta, mean, var = bn
    s = gamma / jnp.sqrt(var + eps)
    return x * s[None, :, None, None] + (beta - s * mean)[None, :, None, None]


def _conv_nchw(x, w, b=None, padding=0):
    y = jax.lax.conv_general_dilated(
        x, w, window_strides=(1, 1),
        padding=((padding, padding), (padding, padding)),
        dimension_numbers=("NCHW", "OIHW", "NCHW"))
    if b is not None:
        y = y + b[None, :, None, None]
    return y


def reference_forward(x, p, time_steps):
    B_T, C, H, W = x.shape
    T = time_steps
    B = B_T // T
    xr = x.reshape(B, T * C, H, W)
    a = _conv_nchw(xr, p["attn_w1"].reshape(C, T * C, 1, 1), p["attn_b1"])
    a = jnp.maximum(_bn_nchw(a, p["attn_bn1"]), 0.0)
    a = _conv_nchw(a, p["attn_w2"].reshape(T, C, 1, 1), p["attn_b2"])
    a = _sigmoid(_bn_nchw(a, p["attn_bn2"]))                     # (B, T, H, W)
    attn = a / jnp.sum(a, axis=1, keepdims=True)
    xt = x.reshape(B, T, C, H, W)
    ws = jnp.sum(xt * attn[:, :, None, :, :], axis=1)            # (B, C, H, W)
    g = _sigmoid(_conv_nchw(ws, p["gate_w"].reshape(T, C, 1, 1), p["gate_b"]))
    xg = g[:, :, None, :, :] * xt + (1.0 - g[:, :, None, :, :]) * ws[:, None]
    xg = xg.reshape(B_T, C, H, W)
    h = _conv_nchw(xg, p["spatial_w"], None, padding=1)
    h = jnp.clip(_bn_nchw(h, p["spatial_bn"]), 0.0, 6.0)         # ReLU6
    y = _conv_nchw(h, p["point_w"][:, :, None, None], None)
    return _bn_nchw(y, p["point_bn"])


if __name__ == "__main__":
    B, T, C = 2, 4, 4
    H = W = 16
    mid = round(C * 6)            # expand_ratio = 6 -> 24
    Cout = C
    B_T = B * T

    key = jax.random.PRNGKey(0)
    ks = jax.random.split(key, 13)

    def bn_params(k, n):
        k1, k2, k3, k4 = jax.random.split(k, 4)
        return (1.0 + 0.1 * jax.random.normal(k1, (n,), jnp.float32),
                0.1 * jax.random.normal(k2, (n,), jnp.float32),
                0.1 * jax.random.normal(k3, (n,), jnp.float32),
                jax.random.uniform(k4, (n,), jnp.float32, 0.5, 1.5))

    x = jax.random.normal(ks[0], (B_T, C, H, W), jnp.float32)
    params = {
        "attn_w1": 0.2 * jax.random.normal(ks[1], (C, T * C), jnp.float32),
        "attn_b1": 0.1 * jax.random.normal(ks[2], (C,), jnp.float32),
        "attn_bn1": bn_params(ks[3], C),
        "attn_w2": 0.2 * jax.random.normal(ks[4], (T, C), jnp.float32),
        "attn_b2": 0.1 * jax.random.normal(ks[5], (T,), jnp.float32),
        "attn_bn2": bn_params(ks[6], T),
        "gate_w": 0.2 * jax.random.normal(ks[7], (T, C), jnp.float32),
        "gate_b": 0.1 * jax.random.normal(ks[8], (T,), jnp.float32),
        "spatial_w": 0.2 * jax.random.normal(ks[9], (mid, C, 3, 3), jnp.float32),
        "spatial_bn": bn_params(ks[10], mid),
        "point_w": 0.2 * jax.random.normal(ks[11], (Cout, mid), jnp.float32),
        "point_bn": bn_params(ks[12], Cout),
    }

    ref = reference_forward(x, params, T)

    # Exact-precision path (f32 MXU inputs): tight correctness gate.
    fwd_f32 = jax.jit(functools.partial(
        ti_fused_mbconv_forward, time_steps=T, matmul_dtype=jnp.float32))
    out = jax.block_until_ready(fwd_f32(x, params))
    assert out.shape == (B_T, Cout, H, W), out.shape
    err = float(jnp.max(jnp.abs(out - ref)))
    assert err < 1e-4, err

    # Perf-default path (bf16 MXU inputs, f32 accumulation): loose sanity bound.
    fwd_bf16 = jax.jit(functools.partial(
        ti_fused_mbconv_forward, time_steps=T, matmul_dtype=jnp.bfloat16))
    out_bf = jax.block_until_ready(fwd_bf16(x, params))
    err_bf = float(jnp.max(jnp.abs(out_bf.astype(jnp.float32) - ref)))
    assert err_bf < 0.3, err_bf

    print("KERNEL_OK")
</pallas_src>

<mosaic_0001>
module attributes {stable_mosaic.version = 11 : i64} {
  func.func @kernel(%arg0: i32, %arg1: memref<1x16x256xf32, #tpu.memory_space<vmem>>, %arg2: memref<9x256xf32, #tpu.memory_space<vmem>>, %arg3: memref<4x16xf32, #tpu.memory_space<vmem>>, %arg4: memref<4x1xf32, #tpu.memory_space<vmem>>, %arg5: memref<4x4xf32, #tpu.memory_space<vmem>>, %arg6: memref<4x1xf32, #tpu.memory_space<vmem>>, %arg7: memref<4x4xf32, #tpu.memory_space<vmem>>, %arg8: memref<4x1xf32, #tpu.memory_space<vmem>>, %arg9: memref<24x36xf32, #tpu.memory_space<vmem>>, %arg10: memref<24x1xf32, #tpu.memory_space<vmem>>, %arg11: memref<4x24xf32, #tpu.memory_space<vmem>>, %arg12: memref<4x1xf32, #tpu.memory_space<vmem>>, %arg13: memref<1x4x4x256xf32, #tpu.memory_space<vmem>>, %arg14: memref<36x256xf32, #tpu.memory_space<vmem>>) attributes {dimension_semantics = [#tpu.dimension_semantics<parallel>], iteration_bounds = array<i64: 2>, scalar_prefetch = 0 : i64, scratch_operands = 1 : i64, tpu.core_type = #tpu.core_type<tc>, window_params = [{transform_indices = @transform_0, window_bounds = array<i64: 1, 16, 256>}, {pipeline_mode = #tpu.pipeline_mode<synchronous>, transform_indices = @transform_1, window_bounds = array<i64: 9, 256>}, {pipeline_mode = #tpu.pipeline_mode<synchronous>, transform_indices = @transform_2, window_bounds = array<i64: 4, 16>}, {pipeline_mode = #tpu.pipeline_mode<synchronous>, transform_indices = @transform_3, window_bounds = array<i64: 4, 1>}, {pipeline_mode = #tpu.pipeline_mode<synchronous>, transform_indices = @transform_4, window_bounds = array<i64: 4, 4>}, {pipeline_mode = #tpu.pipeline_mode<synchronous>, transform_indices = @transform_5, window_bounds = array<i64: 4, 1>}, {pipeline_mode = #tpu.pipeline_mode<synchronous>, transform_indices = @transform_6, window_bounds = array<i64: 4, 4>}, {pipeline_mode = #tpu.pipeline_mode<synchronous>, transform_indices = @transform_7, window_bounds = array<i64: 4, 1>}, {pipeline_mode = #tpu.pipeline_mode<synchronous>, transform_indices = @transform_8, window_bounds = array<i64: 24, 36>}, {pipeline_mode = #tpu.pipeline_mode<synchronous>, transform_indices = @transform_9, window_bounds = array<i64: 24, 1>}, {pipeline_mode = #tpu.pipeline_mode<synchronous>, transform_indices = @transform_10, window_bounds = array<i64: 4, 24>}, {pipeline_mode = #tpu.pipeline_mode<synchronous>, transform_indices = @transform_11, window_bounds = array<i64: 4, 1>}, {transform_indices = @transform_12, window_bounds = array<i64: 1, 4, 4, 256>}]} {
    %c0 = arith.constant 0 : index
    %c0_0 = arith.constant 0 : index
    %c0_1 = arith.constant 0 : index
    %0 = vector.load %arg1[%c0, %c0_0, %c0_1] : memref<1x16x256xf32, #tpu.memory_space<vmem>>, vector<1x16x256xf32>
    %1 = vector.shape_cast %0 : vector<1x16x256xf32> to vector<16x256xf32>
    %c0_2 = arith.constant 0 : index
    %c0_3 = arith.constant 0 : index
    %2 = vector.load %arg3[%c0_2, %c0_3] : memref<4x16xf32, #tpu.memory_space<vmem>>, vector<4x16xf32>
    %cst = arith.constant dense<0.000000e+00> : vector<4x256xf32>
    %3 = tpu.matmul %2, %1, %cst {dimension_numbers = #tpu.dot_dimension_numbers<[1], [0], [0], [1], [0, 0, 1, 1], [], []>} : vector<4x16xf32>, vector<16x256xf32>, vector<4x256xf32> -> vector<4x256xf32>
    %c0_4 = arith.constant 0 : index
    %c0_5 = arith.constant 0 : index
    %4 = vector.load %arg4[%c0_4, %c0_5] : memref<4x1xf32, #tpu.memory_space<vmem>>, vector<4x1xf32>
    %5 = vector.broadcast %4 : vector<4x1xf32> to vector<4x256xf32>
    %6 = arith.addf %3, %5 : vector<4x256xf32>
    %cst_6 = arith.constant 0.000000e+00 : f32
    %7 = vector.broadcast %cst_6 : f32 to vector<4x256xf32>
    %8 = arith.maximumf %6, %7 : vector<4x256xf32>
    %c0_7 = arith.constant 0 : index
    %c0_8 = arith.constant 0 : index
    %9 = vector.load %arg5[%c0_7, %c0_8] : memref<4x4xf32, #tpu.memory_space<vmem>>, vector<4x4xf32>
    %cst_9 = arith.constant dense<0.000000e+00> : vector<4x256xf32>
    %10 = tpu.matmul %9, %8, %cst_9 {dimension_numbers = #tpu.dot_dimension_numbers<[1], [0], [0], [1], [0, 0, 1, 1], [], []>} : vector<4x4xf32>, vector<4x256xf32>, vector<4x256xf32> -> vector<4x256xf32>
    %c0_10 = arith.constant 0 : index
    %c0_11 = arith.constant 0 : index
    %11 = vector.load %arg6[%c0_10, %c0_11] : memref<4x1xf32, #tpu.memory_space<vmem>>, vector<4x1xf32>
    %12 = vector.broadcast %11 : vector<4x1xf32> to vector<4x256xf32>
    %13 = arith.addf %10, %12 : vector<4x256xf32>
    %14 = arith.negf %13 : vector<4x256xf32>
    %15 = math.exp %14 : vector<4x256xf32>
    %cst_12 = arith.constant 1.000000e+00 : f32
    %16 = vector.broadcast %cst_12 : f32 to vector<4x256xf32>
    %17 = arith.addf %16, %15 : vector<4x256xf32>
    %18 = arith.divf %16, %17 : vector<4x256xf32>
    %cst_13 = arith.constant dense<0.000000e+00> : vector<256xf32>
    %19 = vector.multi_reduction <add>, %18, %cst_13 [0] : vector<4x256xf32> to vector<256xf32>
    %20 = vector.shape_cast %19 : vector<256xf32> to vector<1x256xf32>
    %21 = tpu.reciprocal %20 : vector<1x256xf32> -> vector<1x256xf32>
    %22 = vector.broadcast %21 : vector<1x256xf32> to vector<4x256xf32>
    %23 = arith.mulf %18, %22 : vector<4x256xf32>
    %24 = vector.extract_strided_slice %23 {offsets = [0, 0], sizes = [1, 256], strides = [1, 1]} : vector<4x256xf32> to vector<1x256xf32>
    %25 = vector.extract_strided_slice %1 {offsets = [0, 0], sizes = [4, 256], strides = [1, 1]} : vector<16x256xf32> to vector<4x256xf32>
    %26 = vector.broadcast %24 : vector<1x256xf32> to vector<4x256xf32>
    %27 = arith.mulf %26, %25 : vector<4x256xf32>
    %28 = vector.extract_strided_slice %23 {offsets = [1, 0], sizes = [1, 256], strides = [1, 1]} : vector<4x256xf32> to vector<1x256xf32>
    %29 = vector.extract_strided_slice %1 {offsets = [4, 0], sizes = [4, 256], strides = [1, 1]} : vector<16x256xf32> to vector<4x256xf32>
    %30 = vector.broadcast %28 : vector<1x256xf32> to vector<4x256xf32>
    %31 = arith.mulf %30, %29 : vector<4x256xf32>
    %32 = arith.addf %27, %31 : vector<4x256xf32>
    %33 = vector.extract_strided_slice %23 {offsets = [2, 0], sizes = [1, 256], strides = [1, 1]} : vector<4x256xf32> to vector<1x256xf32>
    %34 = vector.extract_strided_slice %1 {offsets = [8, 0], sizes = [4, 256], strides = [1, 1]} : vector<16x256xf32> to vector<4x256xf32>
    %35 = vector.broadcast %33 : vector<1x256xf32> to vector<4x256xf32>
    %36 = arith.mulf %35, %34 : vector<4x256xf32>
    %37 = arith.addf %32, %36 : vector<4x256xf32>
    %38 = vector.extract_strided_slice %23 {offsets = [3, 0], sizes = [1, 256], strides = [1, 1]} : vector<4x256xf32> to vector<1x256xf32>
    %39 = vector.extract_strided_slice %1 {offsets = [12, 0], sizes = [4, 256], strides = [1, 1]} : vector<16x256xf32> to vector<4x256xf32>
    %40 = vector.broadcast %38 : vector<1x256xf32> to vector<4x256xf32>
    %41 = arith.mulf %40, %39 : vector<4x256xf32>
    %42 = arith.addf %37, %41 : vector<4x256xf32>
    %c0_14 = arith.constant 0 : index
    %c0_15 = arith.constant 0 : index
    %43 = vector.load %arg7[%c0_14, %c0_15] : memref<4x4xf32, #tpu.memory_space<vmem>>, vector<4x4xf32>
    %cst_16 = arith.constant dense<0.000000e+00> : vector<4x256xf32>
    %44 = tpu.matmul %43, %42, %cst_16 {dimension_numbers = #tpu.dot_dimension_numbers<[1], [0], [0], [1], [0, 0, 1, 1], [], []>} : vector<4x4xf32>, vector<4x256xf32>, vector<4x256xf32> -> vector<4x256xf32>
    %c0_17 = arith.constant 0 : index
    %c0_18 = arith.constant 0 : index
    %45 = vector.load %arg8[%c0_17, %c0_18] : memref<4x1xf32, #tpu.memory_space<vmem>>, vector<4x1xf32>
    %46 = vector.broadcast %45 : vector<4x1xf32> to vector<4x256xf32>
    %47 = arith.addf %44, %46 : vector<4x256xf32>
    %48 = arith.negf %47 : vector<4x256xf32>
    %49 = math.exp %48 : vector<4x256xf32>
    %cst_19 = arith.constant 1.000000e+00 : f32
    %50 = vector.broadcast %cst_19 : f32 to vector<4x256xf32>
    %51 = arith.addf %50, %49 : vector<4x256xf32>
    %52 = arith.divf %50, %51 : vector<4x256xf32>
    %c0_20 = arith.constant 0 : index
    %c0_21 = arith.constant 0 : index
    %53 = vector.load %arg9[%c0_20, %c0_21] : memref<24x36xf32, #tpu.memory_space<vmem>>, vector<24x36xf32>
    %c0_22 = arith.constant 0 : index
    %c0_23 = arith.constant 0 : index
    %54 = vector.load %arg11[%c0_22, %c0_23] : memref<4x24xf32, #tpu.memory_space<vmem>>, vector<4x24xf32>
    %c0_24 = arith.constant 0 : index
    %c0_25 = arith.constant 0 : index
    %55 = vector.load %arg10[%c0_24, %c0_25] : memref<24x1xf32, #tpu.memory_space<vmem>>, vector<24x1xf32>
    %c0_26 = arith.constant 0 : index
    %c0_27 = arith.constant 0 : index
    %56 = vector.load %arg12[%c0_26, %c0_27] : memref<4x1xf32, #tpu.memory_space<vmem>>, vector<4x1xf32>
    %cst_28 = arith.constant 0.000000e+00 : f32
    %57 = vector.broadcast %cst_28 : f32 to vector<36x256xf32>
    %c0_29 = arith.constant 0 : index
    %c0_30 = arith.constant 0 : index
    %58 = vector.load %arg14[%c0_29, %c0_30] : memref<36x256xf32, #tpu.memory_space<vmem>>, vector<36x256xf32>
    tpu.vector_store %arg14[%c0_29, %c0_30], %57 {strides = array<i32>} : memref<36x256xf32, #tpu.memory_space<vmem>>, vector<36x256xf32>,
    %59 = vector.extract_strided_slice %52 {offsets = [0, 0], sizes = [1, 256], strides = [1, 1]} : vector<4x256xf32> to vector<1x256xf32>
    %60 = vector.extract_strided_slice %1 {offsets = [0, 0], sizes = [4, 256], strides = [1, 1]} : vector<16x256xf32> to vector<4x256xf32>
    %61 = vector.broadcast %59 : vector<1x256xf32> to vector<4x256xf32>
    %62 = arith.mulf %61, %60 : vector<4x256xf32>
    %cst_31 = arith.constant 1.000000e+00 : f32
    %63 = vector.broadcast %cst_31 : f32 to vector<1x256xf32>
    %64 = arith.subf %63, %59 : vector<1x256xf32>
    %65 = vector.broadcast %64 : vector<1x256xf32> to vector<4x256xf32>
    %66 = arith.mulf %65, %42 : vector<4x256xf32>
    %67 = arith.addf %62, %66 : vector<4x256xf32>
    %68 = vector.extract_strided_slice %67 {offsets = [0, 0], sizes = [4, 239], strides = [1, 1]} : vector<4x256xf32> to vector<4x239xf32>
    %c0_32 = arith.constant 0 : index
    %c17 = arith.constant 17 : index
    %69 = vector.load %arg2[%c0_32, %c17] : memref<9x256xf32, #tpu.memory_space<vmem>>, vector<1x239xf32>
    %70 = vector.broadcast %69 : vector<1x239xf32> to vector<4x239xf32>
    %71 = arith.mulf %68, %70 : vector<4x239xf32>
    %c0_33 = arith.constant 0 : index
    %c17_34 = arith.constant 17 : index
    %72 = vector.load %arg14[%c0_33, %c17_34] : memref<36x256xf32, #tpu.memory_space<vmem>>, vector<4x239xf32>
    tpu.vector_store %arg14[%c0_33, %c17_34], %71 {strides = array<i32>} : memref<36x256xf32, #tpu.memory_space<vmem>>, vector<4x239xf32>,
    %73 = vector.extract_strided_slice %67 {offsets = [0, 0], sizes = [4, 240], strides = [1, 1]} : vector<4x256xf32> to vector<4x240xf32>
    %c1 = arith.constant 1 : index
    %c16 = arith.constant 16 : index
    %74 = vector.load %arg2[%c1, %c16] : memref<9x256xf32, #tpu.memory_space<vmem>>, vector<1x240xf32>
    %75 = vector.broadcast %74 : vector<1x240xf32> to vector<4x240xf32>
    %76 = arith.mulf %73, %75 : vector<4x240xf32>
    %c4 = arith.constant 4 : index
    %c16_35 = arith.constant 16 : index
    %77 = vector.load %arg14[%c4, %c16_35] : memref<36x256xf32, #tpu.memory_space<vmem>>, vector<4x240xf32>
    tpu.vector_store %arg14[%c4, %c16_35], %76 {strides = array<i32>} : memref<36x256xf32, #tpu.memory_space<vmem>>, vector<4x240xf32>,
    %78 = vector.extract_strided_slice %67 {offsets = [0, 0], sizes = [4, 241], strides = [1, 1]} : vector<4x256xf32> to vector<4x241xf32>
    %c2 = arith.constant 2 : index
    %c15 = arith.constant 15 : index
    %79 = vector.load %arg2[%c2, %c15] : memref<9x256xf32, #tpu.memory_space<vmem>>, vector<1x241xf32>
    %80 = vector.broadcast %79 : vector<1x241xf32> to vector<4x241xf32>
    %81 = arith.mulf %78, %80 : vector<4x241xf32>
    %c8 = arith.constant 8 : index
    %c15_36 = arith.constant 15 : index
    %82 = vector.load %arg14[%c8, %c15_36] : memref<36x256xf32, #tpu.memory_space<vmem>>, vector<4x241xf32>
    tpu.vector_store %arg14[%c8, %c15_36], %81 {strides = array<i32>} : memref<36x256xf32, #tpu.memory_space<vmem>>, vector<4x241xf32>,
    %83 = vector.extract_strided_slice %67 {offsets = [0, 0], sizes = [4, 255], strides = [1, 1]} : vector<4x256xf32> to vector<4x255xf32>
    %c3 = arith.constant 3 : index
    %c1_37 = arith.constant 1 : index
    %84 = vector.load %arg2[%c3, %c1_37] : memref<9x256xf32, #tpu.memory_space<vmem>>, vector<1x255xf32>
    %85 = vector.broadcast %84 : vector<1x255xf32> to vector<4x255xf32>
    %86 = arith.mulf %83, %85 : vector<4x255xf32>
    %c12 = arith.constant 12 : index
    %c1_38 = arith.constant 1 : index
    %87 = vector.load %arg14[%c12, %c1_38] : memref<36x256xf32, #tpu.memory_space<vmem>>, vector<4x255xf32>
    tpu.vector_store %arg14[%c12, %c1_38], %86 {strides = array<i32>} : memref<36x256xf32, #tpu.memory_space<vmem>>, vector<4x255xf32>,
    %c4_39 = arith.constant 4 : index
    %c0_40 = arith.constant 0 : index
    %88 = vector.load %arg2[%c4_39, %c0_40] : memref<9x256xf32, #tpu.memory_space<vmem>>, vector<1x256xf32>
    %89 = vector.broadcast %88 : vector<1x256xf32> to vector<4x256xf32>
    %90 = arith.mulf %67, %89 : vector<4x256xf32>
    %c16_41 = arith.constant 16 : index
    %c0_42 = arith.constant 0 : index
    %91 = vector.load %arg14[%c16_41, %c0_42] : memref<36x256xf32, #tpu.memory_space<vmem>>, vector<4x256xf32>
    tpu.vector_store %arg14[%c16_41, %c0_42], %90 {strides = array<i32>} : memref<36x256xf32, #tpu.memory_space<vmem>>, vector<4x256xf32>,
    %92 = vector.extract_strided_slice %67 {offsets = [0, 1], sizes = [4, 255], strides = [1, 1]} : vector<4x256xf32> to vector<4x255xf32>
    %c5 = arith.constant 5 : index
    %c0_43 = arith.constant 0 : index
    %93 = vector.load %arg2[%c5, %c0_43] : memref<9x256xf32, #tpu.memory_space<vmem>>, vector<1x255xf32>
    %94 = vector.broadcast %93 : vector<1x255xf32> to vector<4x255xf32>
    %95 = arith.mulf %92, %94 : vector<4x255xf32>
    %c20 = arith.constant 20 : index
    %c0_44 = arith.constant 0 : index
    %96 = vector.load %arg14[%c20, %c0_44] : memref<36x256xf32, #tpu.memory_space<vmem>>, vector<4x255xf32>
    tpu.vector_store %arg14[%c20, %c0_44], %95 {strides = array<i32>} : memref<36x256xf32, #tpu.memory_space<vmem>>, vector<4x255xf32>,
    %97 = vector.extract_strided_slice %67 {offsets = [0, 15], sizes = [4, 241], strides = [1, 1]} : vector<4x256xf32> to vector<4x241xf32>
    %c6 = arith.constant 6 : index
    %c0_45 = arith.constant 0 : index
    %98 = vector.load %arg2[%c6, %c0_45] : memref<9x256xf32, #tpu.memory_space<vmem>>, vector<1x241xf32>
    %99 = vector.broadcast %98 : vector<1x241xf32> to vector<4x241xf32>
    %100 = arith.mulf %97, %99 : vector<4x241xf32>
    %c24 = arith.constant 24 : index
    %c0_46 = arith.constant 0 : index
    %101 = vector.load %arg14[%c24, %c0_46] : memref<36x256xf32, #tpu.memory_space<vmem>>, vector<4x241xf32>
    tpu.vector_store %arg14[%c24, %c0_46], %100 {strides = array<i32>} : memref<36x256xf32, #tpu.memory_space<vmem>>, vector<4x241xf32>,
    %102 = vector.extract_strided_slice %67 {offsets = [0, 16], sizes = [4, 240], strides = [1, 1]} : vector<4x256xf32> to vector<4x240xf32>
    %c7 = arith.constant 7 : index
    %c0_47 = arith.constant 0 : index
    %103 = vector.load %arg2[%c7, %c0_47] : memref<9x256xf32, #tpu.memory_space<vmem>>, vector<1x240xf32>
    %104 = vector.broadcast %103 : vector<1x240xf32> to vector<4x240xf32>
    %105 = arith.mulf %102, %104 : vector<4x240xf32>
    %c28 = arith.constant 28 : index
    %c0_48 = arith.constant 0 : index
    %106 = vector.load %arg14[%c28, %c0_48] : memref<36x256xf32, #tpu.memory_space<vmem>>, vector<4x240xf32>
    tpu.vector_store %arg14[%c28, %c0_48], %105 {strides = array<i32>} : memref<36x256xf32, #tpu.memory_space<vmem>>, vector<4x240xf32>,
    %107 = vector.extract_strided_slice %67 {offsets = [0, 17], sizes = [4, 239], strides = [1, 1]} : vector<4x256xf32> to vector<4x239xf32>
    %c8_49 = arith.constant 8 : index
    %c0_50 = arith.constant 0 : index
    %108 = vector.load %arg2[%c8_49, %c0_50] : memref<9x256xf32, #tpu.memory_space<vmem>>, vector<1x239xf32>
    %109 = vector.broadcast %108 : vector<1x239xf32> to vector<4x239xf32>
    %110 = arith.mulf %107, %109 : vector<4x239xf32>
    %c32 = arith.constant 32 : index
    %c0_51 = arith.constant 0 : index
    %111 = vector.load %arg14[%c32, %c0_51] : memref<36x256xf32, #tpu.memory_space<vmem>>, vector<4x239xf32>
    tpu.vector_store %arg14[%c32, %c0_51], %110 {strides = array<i32>} : memref<36x256xf32, #tpu.memory_space<vmem>>, vector<4x239xf32>,
    %c0_52 = arith.constant 0 : index
    %c0_53 = arith.constant 0 : index
    %112 = vector.load %arg14[%c0_52, %c0_53] : memref<36x256xf32, #tpu.memory_space<vmem>>, vector<36x256xf32>
    %cst_54 = arith.constant dense<0.000000e+00> : vector<24x256xf32>
    %113 = tpu.matmul %53, %112, %cst_54 {dimension_numbers = #tpu.dot_dimension_numbers<[1], [0], [0], [1], [0, 0, 1, 1], [], []>} : vector<24x36xf32>, vector<36x256xf32>, vector<24x256xf32> -> vector<24x256xf32>
    %114 = vector.broadcast %55 : vector<24x1xf32> to vector<24x256xf32>
    %115 = arith.addf %113, %114 : vector<24x256xf32>
    %cst_55 = arith.constant 0.000000e+00 : f32
    %116 = vector.broadcast %cst_55 : f32 to vector<24x256xf32>
    %117 = arith.maximumf %115, %116 : vector<24x256xf32>
    %cst_56 = arith.constant 6.000000e+00 : f32
    %118 = vector.broadcast %cst_56 : f32 to vector<24x256xf32>
    %119 = arith.minimumf %117, %118 : vector<24x256xf32>
    %cst_57 = arith.constant dense<0.000000e+00> : vector<4x256xf32>
    %120 = tpu.matmul %54, %119, %cst_57 {dimension_numbers = #tpu.dot_dimension_numbers<[1], [0], [0], [1], [0, 0, 1, 1], [], []>} : vector<4x24xf32>, vector<24x256xf32>, vector<4x256xf32> -> vector<4x256xf32>
    %121 = vector.broadcast %56 : vector<4x1xf32> to vector<4x256xf32>
    %122 = arith.addf %120, %121 : vector<4x256xf32>
    %c0_58 = arith.constant 0 : index
    %c0_59 = arith.constant 0 : index
    %c0_60 = arith.constant 0 : index
    %c0_61 = arith.constant 0 : index
    %123 = vector.load %arg13[%c0_58, %c0_59, %c0_60, %c0_61] : memref<1x4x4x256xf32, #tpu.memory_space<vmem>>, vector<1x1x4x256xf32>
    %124 = vector.shape_cast %123 : vector<1x1x4x256xf32> to vector<4x256xf32>
    %125 = vector.shape_cast %122 : vector<4x256xf32> to vector<1x1x4x256xf32>
    tpu.vector_store %arg13[%c0_58, %c0_59, %c0_60, %c0_61], %125 {strides = array<i32>} : memref<1x4x4x256xf32, #tpu.memory_space<vmem>>, vector<1x1x4x256xf32>,
    %126 = vector.extract_strided_slice %52 {offsets = [1, 0], sizes = [1, 256], strides = [1, 1]} : vector<4x256xf32> to vector<1x256xf32>
    %127 = vector.extract_strided_slice %1 {offsets = [4, 0], sizes = [4, 256], strides = [1, 1]} : vector<16x256xf32> to vector<4x256xf32>
    %128 = vector.broadcast %126 : vector<1x256xf32> to vector<4x256xf32>
    %129 = arith.mulf %128, %127 : vector<4x256xf32>
    %cst_62 = arith.constant 1.000000e+00 : f32
    %130 = vector.broadcast %cst_62 : f32 to vector<1x256xf32>
    %131 = arith.subf %130, %126 : vector<1x256xf32>
    %132 = vector.broadcast %131 : vector<1x256xf32> to vector<4x256xf32>
    %133 = arith.mulf %132, %42 : vector<4x256xf32>
    %134 = arith.addf %129, %133 : vector<4x256xf32>
    %135 = vector.extract_strided_slice %134 {offsets = [0, 0], sizes = [4, 239], strides = [1, 1]} : vector<4x256xf32> to vector<4x239xf32>
    %c0_63 = arith.constant 0 : index
    %c17_64 = arith.constant 17 : index
    %136 = vector.load %arg2[%c0_63, %c17_64] : memref<9x256xf32, #tpu.memory_space<vmem>>, vector<1x239xf32>
    %137 = vector.broadcast %136 : vector<1x239xf32> to vector<4x239xf32>
    %138 = arith.mulf %135, %137 : vector<4x239xf32>
    %c0_65 = arith.constant 0 : index
    %c17_66 = arith.constant 17 : index
    %139 = vector.load %arg14[%c0_65, %c17_66] : memref<36x256xf32, #tpu.memory_space<vmem>>, vector<4x239xf32>
    tpu.vector_store %arg14[%c0_65, %c17_66], %138 {strides = array<i32>} : memref<36x256xf32, #tpu.memory_space<vmem>>, vector<4x239xf32>,
    %140 = vector.extract_strided_slice %134 {offsets = [0, 0], sizes = [4, 240], strides = [1, 1]} : vector<4x256xf32> to vector<4x240xf32>
    %c1_67 = arith.constant 1 : index
    %c16_68 = arith.constant 16 : index
    %141 = vector.load %arg2[%c1_67, %c16_68] : memref<9x256xf32, #tpu.memory_space<vmem>>, vector<1x240xf32>
    %142 = vector.broadcast %141 : vector<1x240xf32> to vector<4x240xf32>
    %143 = arith.mulf %140, %142 : vector<4x240xf32>
    %c4_69 = arith.constant 4 : index
    %c16_70 = arith.constant 16 : index
    %144 = vector.load %arg14[%c4_69, %c16_70] : memref<36x256xf32, #tpu.memory_space<vmem>>, vector<4x240xf32>
    tpu.vector_store %arg14[%c4_69, %c16_70], %143 {strides = array<i32>} : memref<36x256xf32, #tpu.memory_space<vmem>>, vector<4x240xf32>,
    %145 = vector.extract_strided_slice %134 {offsets = [0, 0], sizes = [4, 241], strides = [1, 1]} : vector<4x256xf32> to vector<4x241xf32>
    %c2_71 = arith.constant 2 : index
    %c15_72 = arith.constant 15 : index
    %146 = vector.load %arg2[%c2_71, %c15_72] : memref<9x256xf32, #tpu.memory_space<vmem>>, vector<1x241xf32>
    %147 = vector.broadcast %146 : vector<1x241xf32> to vector<4x241xf32>
    %148 = arith.mulf %145, %147 : vector<4x241xf32>
    %c8_73 = arith.constant 8 : index
    %c15_74 = arith.constant 15 : index
    %149 = vector.load %arg14[%c8_73, %c15_74] : memref<36x256xf32, #tpu.memory_space<vmem>>, vector<4x241xf32>
    tpu.vector_store %arg14[%c8_73, %c15_74], %148 {strides = array<i32>} : memref<36x256xf32, #tpu.memory_space<vmem>>, vector<4x241xf32>,
    %150 = vector.extract_strided_slice %134 {offsets = [0, 0], sizes = [4, 255], strides = [1, 1]} : vector<4x256xf32> to vector<4x255xf32>
    %c3_75 = arith.constant 3 : index
    %c1_76 = arith.constant 1 : index
    %151 = vector.load %arg2[%c3_75, %c1_76] : memref<9x256xf32, #tpu.memory_space<vmem>>, vector<1x255xf32>
    %152 = vector.broadcast %151 : vector<1x255xf32> to vector<4x255xf32>
    %153 = arith.mulf %150, %152 : vector<4x255xf32>
    %c12_77 = arith.constant 12 : index
    %c1_78 = arith.constant 1 : index
    %154 = vector.load %arg14[%c12_77, %c1_78] : memref<36x256xf32, #tpu.memory_space<vmem>>, vector<4x255xf32>
    tpu.vector_store %arg14[%c12_77, %c1_78], %153 {strides = array<i32>} : memref<36x256xf32, #tpu.memory_space<vmem>>, vector<4x255xf32>,
    %c4_79 = arith.constant 4 : index
    %c0_80 = arith.constant 0 : index
    %155 = vector.load %arg2[%c4_79, %c0_80] : memref<9x256xf32, #tpu.memory_space<vmem>>, vector<1x256xf32>
    %156 = vector.broadcast %155 : vector<1x256xf32> to vector<4x256xf32>
    %157 = arith.mulf %134, %156 : vector<4x256xf32>
    %c16_81 = arith.constant 16 : index
    %c0_82 = arith.constant 0 : index
    %158 = vector.load %arg14[%c16_81, %c0_82] : memref<36x256xf32, #tpu.memory_space<vmem>>, vector<4x256xf32>
    tpu.vector_store %arg14[%c16_81, %c0_82], %157 {strides = array<i32>} : memref<36x256xf32, #tpu.memory_space<vmem>>, vector<4x256xf32>,
    %159 = vector.extract_strided_slice %134 {offsets = [0, 1], sizes = [4, 255], strides = [1, 1]} : vector<4x256xf32> to vector<4x255xf32>
    %c5_83 = arith.constant 5 : index
    %c0_84 = arith.constant 0 : index
    %160 = vector.load %arg2[%c5_83, %c0_84] : memref<9x256xf32, #tpu.memory_space<vmem>>, vector<1x255xf32>
    %161 = vector.broadcast %160 : vector<1x255xf32> to vector<4x255xf32>
    %162 = arith.mulf %159, %161 : vector<4x255xf32>
    %c20_85 = arith.constant 20 : index
    %c0_86 = arith.constant 0 : index
    %163 = vector.load %arg14[%c20_85, %c0_86] : memref<36x256xf32, #tpu.memory_space<vmem>>, vector<4x255xf32>
    tpu.vector_store %arg14[%c20_85, %c0_86], %162 {strides = array<i32>} : memref<36x256xf32, #tpu.memory_space<vmem>>, vector<4x255xf32>,
    %164 = vector.extract_strided_slice %134 {offsets = [0, 15], sizes = [4, 241], strides = [1, 1]} : vector<4x256xf32> to vector<4x241xf32>
    %c6_87 = arith.constant 6 : index
    %c0_88 = arith.constant 0 : index
    %165 = vector.load %arg2[%c6_87, %c0_88] : memref<9x256xf32, #tpu.memory_space<vmem>>, vector<1x241xf32>
    %166 = vector.broadcast %165 : vector<1x241xf32> to vector<4x241xf32>
    %167 = arith.mulf %164, %166 : vector<4x241xf32>
    %c24_89 = arith.constant 24 : index
    %c0_90 = arith.constant 0 : index
    %168 = vector.load %arg14[%c24_89, %c0_90] : memref<36x256xf32, #tpu.memory_space<vmem>>, vector<4x241xf32>
    tpu.vector_store %arg14[%c24_89, %c0_90], %167 {strides = array<i32>} : memref<36x256xf32, #tpu.memory_space<vmem>>, vector<4x241xf32>,
    %169 = vector.extract_strided_slice %134 {offsets = [0, 16], sizes = [4, 240], strides = [1, 1]} : vector<4x256xf32> to vector<4x240xf32>
    %c7_91 = arith.constant 7 : index
    %c0_92 = arith.constant 0 : index
    %170 = vector.load %arg2[%c7_91, %c0_92] : memref<9x256xf32, #tpu.memory_space<vmem>>, vector<1x240xf32>
    %171 = vector.broadcast %170 : vector<1x240xf32> to vector<4x240xf32>
    %172 = arith.mulf %169, %171 : vector<4x240xf32>
    %c28_93 = arith.constant 28 : index
    %c0_94 = arith.constant 0 : index
    %173 = vector.load %arg14[%c28_93, %c0_94] : memref<36x256xf32, #tpu.memory_space<vmem>>, vector<4x240xf32>
    tpu.vector_store %arg14[%c28_93, %c0_94], %172 {strides = array<i32>} : memref<36x256xf32, #tpu.memory_space<vmem>>, vector<4x240xf32>,
    %174 = vector.extract_strided_slice %134 {offsets = [0, 17], sizes = [4, 239], strides = [1, 1]} : vector<4x256xf32> to vector<4x239xf32>
    %c8_95 = arith.constant 8 : index
    %c0_96 = arith.constant 0 : index
    %175 = vector.load %arg2[%c8_95, %c0_96] : memref<9x256xf32, #tpu.memory_space<vmem>>, vector<1x239xf32>
    %176 = vector.broadcast %175 : vector<1x239xf32> to vector<4x239xf32>
    %177 = arith.mulf %174, %176 : vector<4x239xf32>
    %c32_97 = arith.constant 32 : index
    %c0_98 = arith.constant 0 : index
    %178 = vector.load %arg14[%c32_97, %c0_98] : memref<36x256xf32, #tpu.memory_space<vmem>>, vector<4x239xf32>
    tpu.vector_store %arg14[%c32_97, %c0_98], %177 {strides = array<i32>} : memref<36x256xf32, #tpu.memory_space<vmem>>, vector<4x239xf32>,
    %c0_99 = arith.constant 0 : index
    %c0_100 = arith.constant 0 : index
    %179 = vector.load %arg14[%c0_99, %c0_100] : memref<36x256xf32, #tpu.memory_space<vmem>>, vector<36x256xf32>
    %cst_101 = arith.constant dense<0.000000e+00> : vector<24x256xf32>
    %180 = tpu.matmul %53, %179, %cst_101 {dimension_numbers = #tpu.dot_dimension_numbers<[1], [0], [0], [1], [0, 0, 1, 1], [], []>} : vector<24x36xf32>, vector<36x256xf32>, vector<24x256xf32> -> vector<24x256xf32>
    %181 = vector.broadcast %55 : vector<24x1xf32> to vector<24x256xf32>
    %182 = arith.addf %180, %181 : vector<24x256xf32>
    %cst_102 = arith.constant 0.000000e+00 : f32
    %183 = vector.broadcast %cst_102 : f32 to vector<24x256xf32>
    %184 = arith.maximumf %182, %183 : vector<24x256xf32>
    %cst_103 = arith.constant 6.000000e+00 : f32
    %185 = vector.broadcast %cst_103 : f32 to vector<24x256xf32>
    %186 = arith.minimumf %184, %185 : vector<24x256xf32>
    %cst_104 = arith.constant dense<0.000000e+00> : vector<4x256xf32>
    %187 = tpu.matmul %54, %186, %cst_104 {dimension_numbers = #tpu.dot_dimension_numbers<[1], [0], [0], [1], [0, 0, 1, 1], [], []>} : vector<4x24xf32>, vector<24x256xf32>, vector<4x256xf32> -> vector<4x256xf32>
    %188 = vector.broadcast %56 : vector<4x1xf32> to vector<4x256xf32>
    %189 = arith.addf %187, %188 : vector<4x256xf32>
    %c0_105 = arith.constant 0 : index
    %c1_106 = arith.constant 1 : index
    %c0_107 = arith.constant 0 : index
    %c0_108 = arith.constant 0 : index
    %190 = vector.load %arg13[%c0_105, %c1_106, %c0_107, %c0_108] : memref<1x4x4x256xf32, #tpu.memory_space<vmem>>, vector<1x1x4x256xf32>
    %191 = vector.shape_cast %190 : vector<1x1x4x256xf32> to vector<4x256xf32>
    %192 = vector.shape_cast %189 : vector<4x256xf32> to vector<1x1x4x256xf32>
    tpu.vector_store %arg13[%c0_105, %c1_106, %c0_107, %c0_108], %192 {strides = array<i32>} : memref<1x4x4x256xf32, #tpu.memory_space<vmem>>, vector<1x1x4x256xf32>,
    %193 = vector.extract_strided_slice %52 {offsets = [2, 0], sizes = [1, 256], strides = [1, 1]} : vector<4x256xf32> to vector<1x256xf32>
    %194 = vector.extract_strided_slice %1 {offsets = [8, 0], sizes = [4, 256], strides = [1, 1]} : vector<16x256xf32> to vector<4x256xf32>
    %195 = vector.broadcast %193 : vector<1x256xf32> to vector<4x256xf32>
    %196 = arith.mulf %195, %194 : vector<4x256xf32>
    %cst_109 = arith.constant 1.000000e+00 : f32
    %197 = vector.broadcast %cst_109 : f32 to vector<1x256xf32>
    %198 = arith.subf %197, %193 : vector<1x256xf32>
    %199 = vector.broadcast %198 : vector<1x256xf32> to vector<4x256xf32>
    %200 = arith.mulf %199, %42 : vector<4x256xf32>
    %201 = arith.addf %196, %200 : vector<4x256xf32>
    %202 = vector.extract_strided_slice %201 {offsets = [0, 0], sizes = [4, 239], strides = [1, 1]} : vector<4x256xf32> to vector<4x239xf32>
    %c0_110 = arith.constant 0 : index
    %c17_111 = arith.constant 17 : index
    %203 = vector.load %arg2[%c0_110, %c17_111] : memref<9x256xf32, #tpu.memory_space<vmem>>, vector<1x239xf32>
    %204 = vector.broadcast %203 : vector<1x239xf32> to vector<4x239xf32>
    %205 = arith.mulf %202, %204 : vector<4x239xf32>
    %c0_112 = arith.constant 0 : index
    %c17_113 = arith.constant 17 : index
    %206 = vector.load %arg14[%c0_112, %c17_113] : memref<36x256xf32, #tpu.memory_space<vmem>>, vector<4x239xf32>
    tpu.vector_store %arg14[%c0_112, %c17_113], %205 {strides = array<i32>} : memref<36x256xf32, #tpu.memory_space<vmem>>, vector<4x239xf32>,
    %207 = vector.extract_strided_slice %201 {offsets = [0, 0], sizes = [4, 240], strides = [1, 1]} : vector<4x256xf32> to vector<4x240xf32>
    %c1_114 = arith.constant 1 : index
    %c16_115 = arith.constant 16 : index
    %208 = vector.load %arg2[%c1_114, %c16_115] : memref<9x256xf32, #tpu.memory_space<vmem>>, vector<1x240xf32>
    %209 = vector.broadcast %208 : vector<1x240xf32> to vector<4x240xf32>
    %210 = arith.mulf %207, %209 : vector<4x240xf32>
    %c4_116 = arith.constant 4 : index
    %c16_117 = arith.constant 16 : index
    %211 = vector.load %arg14[%c4_116, %c16_117] : memref<36x256xf32, #tpu.memory_space<vmem>>, vector<4x240xf32>
    tpu.vector_store %arg14[%c4_116, %c16_117], %210 {strides = array<i32>} : memref<36x256xf32, #tpu.memory_space<vmem>>, vector<4x240xf32>,
    %212 = vector.extract_strided_slice %201 {offsets = [0, 0], sizes = [4, 241], strides = [1, 1]} : vector<4x256xf32> to vector<4x241xf32>
    %c2_118 = arith.constant 2 : index
    %c15_119 = arith.constant 15 : index
    %213 = vector.load %arg2[%c2_118, %c15_119] : memref<9x256xf32, #tpu.memory_space<vmem>>, vector<1x241xf32>
    %214 = vector.broadcast %213 : vector<1x241xf32> to vector<4x241xf32>
    %215 = arith.mulf %212, %214 : vector<4x241xf32>
    %c8_120 = arith.constant 8 : index
    %c15_121 = arith.constant 15 : index
    %216 = vector.load %arg14[%c8_120, %c15_121] : memref<36x256xf32, #tpu.memory_space<vmem>>, vector<4x241xf32>
    tpu.vector_store %arg14[%c8_120, %c15_121], %215 {strides = array<i32>} : memref<36x256xf32, #tpu.memory_space<vmem>>, vector<4x241xf32>,
    %217 = vector.extract_strided_slice %201 {offsets = [0, 0], sizes = [4, 255], strides = [1, 1]} : vector<4x256xf32> to vector<4x255xf32>
    %c3_122 = arith.constant 3 : index
    %c1_123 = arith.constant 1 : index
    %218 = vector.load %arg2[%c3_122, %c1_123] : memref<9x256xf32, #tpu.memory_space<vmem>>, vector<1x255xf32>
    %219 = vector.broadcast %218 : vector<1x255xf32> to vector<4x255xf32>
    %220 = arith.mulf %217, %219 : vector<4x255xf32>
    %c12_124 = arith.constant 12 : index
    %c1_125 = arith.constant 1 : index
    %221 = vector.load %arg14[%c12_124, %c1_125] : memref<36x256xf32, #tpu.memory_space<vmem>>, vector<4x255xf32>
    tpu.vector_store %arg14[%c12_124, %c1_125], %220 {strides = array<i32>} : memref<36x256xf32, #tpu.memory_space<vmem>>, vector<4x255xf32>,
    %c4_126 = arith.constant 4 : index
    %c0_127 = arith.constant 0 : index
    %222 = vector.load %arg2[%c4_126, %c0_127] : memref<9x256xf32, #tpu.memory_space<vmem>>, vector<1x256xf32>
    %223 = vector.broadcast %222 : vector<1x256xf32> to vector<4x256xf32>
    %224 = arith.mulf %201, %223 : vector<4x256xf32>
    %c16_128 = arith.constant 16 : index
    %c0_129 = arith.constant 0 : index
    %225 = vector.load %arg14[%c16_128, %c0_129] : memref<36x256xf32, #tpu.memory_space<vmem>>, vector<4x256xf32>
    tpu.vector_store %arg14[%c16_128, %c0_129], %224 {strides = array<i32>} : memref<36x256xf32, #tpu.memory_space<vmem>>, vector<4x256xf32>,
    %226 = vector.extract_strided_slice %201 {offsets = [0, 1], sizes = [4, 255], strides = [1, 1]} : vector<4x256xf32> to vector<4x255xf32>
    %c5_130 = arith.constant 5 : index
    %c0_131 = arith.constant 0 : index
    %227 = vector.load %arg2[%c5_130, %c0_131] : memref<9x256xf32, #tpu.memory_space<vmem>>, vector<1x255xf32>
    %228 = vector.broadcast %227 : vector<1x255xf32> to vector<4x255xf32>
    %229 = arith.mulf %226, %228 : vector<4x255xf32>
    %c20_132 = arith.constant 20 : index
    %c0_133 = arith.constant 0 : index
    %230 = vector.load %arg14[%c20_132, %c0_133] : memref<36x256xf32, #tpu.memory_space<vmem>>, vector<4x255xf32>
    tpu.vector_store %arg14[%c20_132, %c0_133], %229 {strides = array<i32>} : memref<36x256xf32, #tpu.memory_space<vmem>>, vector<4x255xf32>,
    %231 = vector.extract_strided_slice %201 {offsets = [0, 15], sizes = [4, 241], strides = [1, 1]} : vector<4x256xf32> to vector<4x241xf32>
    %c6_134 = arith.constant 6 : index
    %c0_135 = arith.constant 0 : index
    %232 = vector.load %arg2[%c6_134, %c0_135] : memref<9x256xf32, #tpu.memory_space<vmem>>, vector<1x241xf32>
    %233 = vector.broadcast %232 : vector<1x241xf32> to vector<4x241xf32>
    %234 = arith.mulf %231, %233 : vector<4x241xf32>
    %c24_136 = arith.constant 24 : index
    %c0_137 = arith.constant 0 : index
    %235 = vector.load %arg14[%c24_136, %c0_137] : memref<36x256xf32, #tpu.memory_space<vmem>>, vector<4x241xf32>
    tpu.vector_store %arg14[%c24_136, %c0_137], %234 {strides = array<i32>} : memref<36x256xf32, #tpu.memory_space<vmem>>, vector<4x241xf32>,
    %236 = vector.extract_strided_slice %201 {offsets = [0, 16], sizes = [4, 240], strides = [1, 1]} : vector<4x256xf32> to vector<4x240xf32>
    %c7_138 = arith.constant 7 : index
    %c0_139 = arith.constant 0 : index
    %237 = vector.load %arg2[%c7_138, %c0_139] : memref<9x256xf32, #tpu.memory_space<vmem>>, vector<1x240xf32>
    %238 = vector.broadcast %237 : vector<1x240xf32> to vector<4x240xf32>
    %239 = arith.mulf %236, %238 : vector<4x240xf32>
    %c28_140 = arith.constant 28 : index
    %c0_141 = arith.constant 0 : index
    %240 = vector.load %arg14[%c28_140, %c0_141] : memref<36x256xf32, #tpu.memory_space<vmem>>, vector<4x240xf32>
    tpu.vector_store %arg14[%c28_140, %c0_141], %239 {strides = array<i32>} : memref<36x256xf32, #tpu.memory_space<vmem>>, vector<4x240xf32>,
    %241 = vector.extract_strided_slice %201 {offsets = [0, 17], sizes = [4, 239], strides = [1, 1]} : vector<4x256xf32> to vector<4x239xf32>
    %c8_142 = arith.constant 8 : index
    %c0_143 = arith.constant 0 : index
    %242 = vector.load %arg2[%c8_142, %c0_143] : memref<9x256xf32, #tpu.memory_space<vmem>>, vector<1x239xf32>
    %243 = vector.broadcast %242 : vector<1x239xf32> to vector<4x239xf32>
    %244 = arith.mulf %241, %243 : vector<4x239xf32>
    %c32_144 = arith.constant 32 : index
    %c0_145 = arith.constant 0 : index
    %245 = vector.load %arg14[%c32_144, %c0_145] : memref<36x256xf32, #tpu.memory_space<vmem>>, vector<4x239xf32>
    tpu.vector_store %arg14[%c32_144, %c0_145], %244 {strides = array<i32>} : memref<36x256xf32, #tpu.memory_space<vmem>>, vector<4x239xf32>,
    %c0_146 = arith.constant 0 : index
    %c0_147 = arith.constant 0 : index
    %246 = vector.load %arg14[%c0_146, %c0_147] : memref<36x256xf32, #tpu.memory_space<vmem>>, vector<36x256xf32>
    %cst_148 = arith.constant dense<0.000000e+00> : vector<24x256xf32>
    %247 = tpu.matmul %53, %246, %cst_148 {dimension_numbers = #tpu.dot_dimension_numbers<[1], [0], [0], [1], [0, 0, 1, 1], [], []>} : vector<24x36xf32>, vector<36x256xf32>, vector<24x256xf32> -> vector<24x256xf32>
    %248 = vector.broadcast %55 : vector<24x1xf32> to vector<24x256xf32>
    %249 = arith.addf %247, %248 : vector<24x256xf32>
    %cst_149 = arith.constant 0.000000e+00 : f32
    %250 = vector.broadcast %cst_149 : f32 to vector<24x256xf32>
    %251 = arith.maximumf %249, %250 : vector<24x256xf32>
    %cst_150 = arith.constant 6.000000e+00 : f32
    %252 = vector.broadcast %cst_150 : f32 to vector<24x256xf32>
    %253 = arith.minimumf %251, %252 : vector<24x256xf32>
    %cst_151 = arith.constant dense<0.000000e+00> : vector<4x256xf32>
    %254 = tpu.matmul %54, %253, %cst_151 {dimension_numbers = #tpu.dot_dimension_numbers<[1], [0], [0], [1], [0, 0, 1, 1], [], []>} : vector<4x24xf32>, vector<24x256xf32>, vector<4x256xf32> -> vector<4x256xf32>
    %255 = vector.broadcast %56 : vector<4x1xf32> to vector<4x256xf32>
    %256 = arith.addf %254, %255 : vector<4x256xf32>
    %c0_152 = arith.constant 0 : index
    %c2_153 = arith.constant 2 : index
    %c0_154 = arith.constant 0 : index
    %c0_155 = arith.constant 0 : index
    %257 = vector.load %arg13[%c0_152, %c2_153, %c0_154, %c0_155] : memref<1x4x4x256xf32, #tpu.memory_space<vmem>>, vector<1x1x4x256xf32>
    %258 = vector.shape_cast %257 : vector<1x1x4x256xf32> to vector<4x256xf32>
    %259 = vector.shape_cast %256 : vector<4x256xf32> to vector<1x1x4x256xf32>
    tpu.vector_store %arg13[%c0_152, %c2_153, %c0_154, %c0_155], %259 {strides = array<i32>} : memref<1x4x4x256xf32, #tpu.memory_space<vmem>>, vector<1x1x4x256xf32>,
    %260 = vector.extract_strided_slice %52 {offsets = [3, 0], sizes = [1, 256], strides = [1, 1]} : vector<4x256xf32> to vector<1x256xf32>
    %261 = vector.extract_strided_slice %1 {offsets = [12, 0], sizes = [4, 256], strides = [1, 1]} : vector<16x256xf32> to vector<4x256xf32>
    %262 = vector.broadcast %260 : vector<1x256xf32> to vector<4x256xf32>
    %263 = arith.mulf %262, %261 : vector<4x256xf32>
    %cst_156 = arith.constant 1.000000e+00 : f32
    %264 = vector.broadcast %cst_156 : f32 to vector<1x256xf32>
    %265 = arith.subf %264, %260 : vector<1x256xf32>
    %266 = vector.broadcast %265 : vector<1x256xf32> to vector<4x256xf32>
    %267 = arith.mulf %266, %42 : vector<4x256xf32>
    %268 = arith.addf %263, %267 : vector<4x256xf32>
    %269 = vector.extract_strided_slice %268 {offsets = [0, 0], sizes = [4, 239], strides = [1, 1]} : vector<4x256xf32> to vector<4x239xf32>
    %c0_157 = arith.constant 0 : index
    %c17_158 = arith.constant 17 : index
    %270 = vector.load %arg2[%c0_157, %c17_158] : memref<9x256xf32, #tpu.memory_space<vmem>>, vector<1x239xf32>
    %271 = vector.broadcast %270 : vector<1x239xf32> to vector<4x239xf32>
    %272 = arith.mulf %269, %271 : vector<4x239xf32>
    %c0_159 = arith.constant 0 : index
    %c17_160 = arith.constant 17 : index
    %273 = vector.load %arg14[%c0_159, %c17_160] : memref<36x256xf32, #tpu.memory_space<vmem>>, vector<4x239xf32>
    tpu.vector_store %arg14[%c0_159, %c17_160], %272 {strides = array<i32>} : memref<36x256xf32, #tpu.memory_space<vmem>>, vector<4x239xf32>,
    %274 = vector.extract_strided_slice %268 {offsets = [0, 0], sizes = [4, 240], strides = [1, 1]} : vector<4x256xf32> to vector<4x240xf32>
    %c1_161 = arith.constant 1 : index
    %c16_162 = arith.constant 16 : index
    %275 = vector.load %arg2[%c1_161, %c16_162] : memref<9x256xf32, #tpu.memory_space<vmem>>, vector<1x240xf32>
    %276 = vector.broadcast %275 : vector<1x240xf32> to vector<4x240xf32>
    %277 = arith.mulf %274, %276 : vector<4x240xf32>
    %c4_163 = arith.constant 4 : index
    %c16_164 = arith.constant 16 : index
    %278 = vector.load %arg14[%c4_163, %c16_164] : memref<36x256xf32, #tpu.memory_space<vmem>>, vector<4x240xf32>
    tpu.vector_store %arg14[%c4_163, %c16_164], %277 {strides = array<i32>} : memref<36x256xf32, #tpu.memory_space<vmem>>, vector<4x240xf32>,
    %279 = vector.extract_strided_slice %268 {offsets = [0, 0], sizes = [4, 241], strides = [1, 1]} : vector<4x256xf32> to vector<4x241xf32>
    %c2_165 = arith.constant 2 : index
    %c15_166 = arith.constant 15 : index
    %280 = vector.load %arg2[%c2_165, %c15_166] : memref<9x256xf32, #tpu.memory_space<vmem>>, vector<1x241xf32>
    %281 = vector.broadcast %280 : vector<1x241xf32> to vector<4x241xf32>
    %282 = arith.mulf %279, %281 : vector<4x241xf32>
    %c8_167 = arith.constant 8 : index
    %c15_168 = arith.constant 15 : index
    %283 = vector.load %arg14[%c8_167, %c15_168] : memref<36x256xf32, #tpu.memory_space<vmem>>, vector<4x241xf32>
    tpu.vector_store %arg14[%c8_167, %c15_168], %282 {strides = array<i32>} : memref<36x256xf32, #tpu.memory_space<vmem>>, vector<4x241xf32>,
    %284 = vector.extract_strided_slice %268 {offsets = [0, 0], sizes = [4, 255], strides = [1, 1]} : vector<4x256xf32> to vector<4x255xf32>
    %c3_169 = arith.constant 3 : index
    %c1_170 = arith.constant 1 : index
    %285 = vector.load %arg2[%c3_169, %c1_170] : memref<9x256xf32, #tpu.memory_space<vmem>>, vector<1x255xf32>
    %286 = vector.broadcast %285 : vector<1x255xf32> to vector<4x255xf32>
    %287 = arith.mulf %284, %286 : vector<4x255xf32>
    %c12_171 = arith.constant 12 : index
    %c1_172 = arith.constant 1 : index
    %288 = vector.load %arg14[%c12_171, %c1_172] : memref<36x256xf32, #tpu.memory_space<vmem>>, vector<4x255xf32>
    tpu.vector_store %arg14[%c12_171, %c1_172], %287 {strides = array<i32>} : memref<36x256xf32, #tpu.memory_space<vmem>>, vector<4x255xf32>,
    %c4_173 = arith.constant 4 : index
    %c0_174 = arith.constant 0 : index
    %289 = vector.load %arg2[%c4_173, %c0_174] : memref<9x256xf32, #tpu.memory_space<vmem>>, vector<1x256xf32>
    %290 = vector.broadcast %289 : vector<1x256xf32> to vector<4x256xf32>
    %291 = arith.mulf %268, %290 : vector<4x256xf32>
    %c16_175 = arith.constant 16 : index
    %c0_176 = arith.constant 0 : index
    %292 = vector.load %arg14[%c16_175, %c0_176] : memref<36x256xf32, #tpu.memory_space<vmem>>, vector<4x256xf32>
    tpu.vector_store %arg14[%c16_175, %c0_176], %291 {strides = array<i32>} : memref<36x256xf32, #tpu.memory_space<vmem>>, vector<4x256xf32>,
    %293 = vector.extract_strided_slice %268 {offsets = [0, 1], sizes = [4, 255], strides = [1, 1]} : vector<4x256xf32> to vector<4x255xf32>
    %c5_177 = arith.constant 5 : index
    %c0_178 = arith.constant 0 : index
    %294 = vector.load %arg2[%c5_177, %c0_178] : memref<9x256xf32, #tpu.memory_space<vmem>>, vector<1x255xf32>
    %295 = vector.broadcast %294 : vector<1x255xf32> to vector<4x255xf32>
    %296 = arith.mulf %293, %295 : vector<4x255xf32>
    %c20_179 = arith.constant 20 : index
    %c0_180 = arith.constant 0 : index
    %297 = vector.load %arg14[%c20_179, %c0_180] : memref<36x256xf32, #tpu.memory_space<vmem>>, vector<4x255xf32>
    tpu.vector_store %arg14[%c20_179, %c0_180], %296 {strides = array<i32>} : memref<36x256xf32, #tpu.memory_space<vmem>>, vector<4x255xf32>,
    %298 = vector.extract_strided_slice %268 {offsets = [0, 15], sizes = [4, 241], strides = [1, 1]} : vector<4x256xf32> to vector<4x241xf32>
    %c6_181 = arith.constant 6 : index
    %c0_182 = arith.constant 0 : index
    %299 = vector.load %arg2[%c6_181, %c0_182] : memref<9x256xf32, #tpu.memory_space<vmem>>, vector<1x241xf32>
    %300 = vector.broadcast %299 : vector<1x241xf32> to vector<4x241xf32>
    %301 = arith.mulf %298, %300 : vector<4x241xf32>
    %c24_183 = arith.constant 24 : index
    %c0_184 = arith.constant 0 : index
    %302 = vector.load %arg14[%c24_183, %c0_184] : memref<36x256xf32, #tpu.memory_space<vmem>>, vector<4x241xf32>
    tpu.vector_store %arg14[%c24_183, %c0_184], %301 {strides = array<i32>} : memref<36x256xf32, #tpu.memory_space<vmem>>, vector<4x241xf32>,
    %303 = vector.extract_strided_slice %268 {offsets = [0, 16], sizes = [4, 240], strides = [1, 1]} : vector<4x256xf32> to vector<4x240xf32>
    %c7_185 = arith.constant 7 : index
    %c0_186 = arith.constant 0 : index
    %304 = vector.load %arg2[%c7_185, %c0_186] : memref<9x256xf32, #tpu.memory_space<vmem>>, vector<1x240xf32>
    %305 = vector.broadcast %304 : vector<1x240xf32> to vector<4x240xf32>
    %306 = arith.mulf %303, %305 : vector<4x240xf32>
    %c28_187 = arith.constant 28 : index
    %c0_188 = arith.constant 0 : index
    %307 = vector.load %arg14[%c28_187, %c0_188] : memref<36x256xf32, #tpu.memory_space<vmem>>, vector<4x240xf32>
    tpu.vector_store %arg14[%c28_187, %c0_188], %306 {strides = array<i32>} : memref<36x256xf32, #tpu.memory_space<vmem>>, vector<4x240xf32>,
    %308 = vector.extract_strided_slice %268 {offsets = [0, 17], sizes = [4, 239], strides = [1, 1]} : vector<4x256xf32> to vector<4x239xf32>
    %c8_189 = arith.constant 8 : index
    %c0_190 = arith.constant 0 : index
    %309 = vector.load %arg2[%c8_189, %c0_190] : memref<9x256xf32, #tpu.memory_space<vmem>>, vector<1x239xf32>
    %310 = vector.broadcast %309 : vector<1x239xf32> to vector<4x239xf32>
    %311 = arith.mulf %308, %310 : vector<4x239xf32>
    %c32_191 = arith.constant 32 : index
    %c0_192 = arith.constant 0 : index
    %312 = vector.load %arg14[%c32_191, %c0_192] : memref<36x256xf32, #tpu.memory_space<vmem>>, vector<4x239xf32>
    tpu.vector_store %arg14[%c32_191, %c0_192], %311 {strides = array<i32>} : memref<36x256xf32, #tpu.memory_space<vmem>>, vector<4x239xf32>,
    %c0_193 = arith.constant 0 : index
    %c0_194 = arith.constant 0 : index
    %313 = vector.load %arg14[%c0_193, %c0_194] : memref<36x256xf32, #tpu.memory_space<vmem>>, vector<36x256xf32>
    %cst_195 = arith.constant dense<0.000000e+00> : vector<24x256xf32>
    %314 = tpu.matmul %53, %313, %cst_195 {dimension_numbers = #tpu.dot_dimension_numbers<[1], [0], [0], [1], [0, 0, 1, 1], [], []>} : vector<24x36xf32>, vector<36x256xf32>, vector<24x256xf32> -> vector<24x256xf32>
    %315 = vector.broadcast %55 : vector<24x1xf32> to vector<24x256xf32>
    %316 = arith.addf %314, %315 : vector<24x256xf32>
    %cst_196 = arith.constant 0.000000e+00 : f32
    %317 = vector.broadcast %cst_196 : f32 to vector<24x256xf32>
    %318 = arith.maximumf %316, %317 : vector<24x256xf32>
    %cst_197 = arith.constant 6.000000e+00 : f32
    %319 = vector.broadcast %cst_197 : f32 to vector<24x256xf32>
    %320 = arith.minimumf %318, %319 : vector<24x256xf32>
    %cst_198 = arith.constant dense<0.000000e+00> : vector<4x256xf32>
    %321 = tpu.matmul %54, %320, %cst_198 {dimension_numbers = #tpu.dot_dimension_numbers<[1], [0], [0], [1], [0, 0, 1, 1], [], []>} : vector<4x24xf32>, vector<24x256xf32>, vector<4x256xf32> -> vector<4x256xf32>
    %322 = vector.broadcast %56 : vector<4x1xf32> to vector<4x256xf32>
    %323 = arith.addf %321, %322 : vector<4x256xf32>
    %c0_199 = arith.constant 0 : index
    %c3_200 = arith.constant 3 : index
    %c0_201 = arith.constant 0 : index
    %c0_202 = arith.constant 0 : index
    %324 = vector.load %arg13[%c0_199, %c3_200, %c0_201, %c0_202] : memref<1x4x4x256xf32, #tpu.memory_space<vmem>>, vector<1x1x4x256xf32>
    %325 = vector.shape_cast %324 : vector<1x1x4x256xf32> to vector<4x256xf32>
    %326 = vector.shape_cast %323 : vector<4x256xf32> to vector<1x1x4x256xf32>
    tpu.vector_store %arg13[%c0_199, %c3_200, %c0_201, %c0_202], %326 {strides = array<i32>} : memref<1x4x4x256xf32, #tpu.memory_space<vmem>>, vector<1x1x4x256xf32>,
    return
  }
  func.func @transform_0(%arg0: i32) -> (i32, i32, i32) {
    %c0_i32 = arith.constant 0 : i32
    %c0_i32_0 = arith.constant 0 : i32
    %c0_i32_1 = arith.constant 0 : i32
    return %arg0, %c0_i32, %c0_i32_0 : i32, i32, i32
  }
  func.func @transform_1(%arg0: i32) -> (i32, i32) {
    %c0_i32 = arith.constant 0 : i32
    %c0_i32_0 = arith.constant 0 : i32
    %c0_i32_1 = arith.constant 0 : i32
    return %c0_i32, %c0_i32_0 : i32, i32
  }
  func.func @transform_2(%arg0: i32) -> (i32, i32) {
    %c0_i32 = arith.constant 0 : i32
    %c0_i32_0 = arith.constant 0 : i32
    %c0_i32_1 = arith.constant 0 : i32
    return %c0_i32, %c0_i32_0 : i32, i32
  }
  func.func @transform_3(%arg0: i32) -> (i32, i32) {
    %c0_i32 = arith.constant 0 : i32
    %c0_i32_0 = arith.constant 0 : i32
    %c0_i32_1 = arith.constant 0 : i32
    return %c0_i32, %c0_i32_0 : i32, i32
  }
  func.func @transform_4(%arg0: i32) -> (i32, i32) {
    %c0_i32 = arith.constant 0 : i32
    %c0_i32_0 = arith.constant 0 : i32
    %c0_i32_1 = arith.constant 0 : i32
    return %c0_i32, %c0_i32_0 : i32, i32
  }
  func.func @transform_5(%arg0: i32) -> (i32, i32) {
    %c0_i32 = arith.constant 0 : i32
    %c0_i32_0 = arith.constant 0 : i32
    %c0_i32_1 = arith.constant 0 : i32
    return %c0_i32, %c0_i32_0 : i32, i32
  }
  func.func @transform_6(%arg0: i32) -> (i32, i32) {
    %c0_i32 = arith.constant 0 : i32
    %c0_i32_0 = arith.constant 0 : i32
    %c0_i32_1 = arith.constant 0 : i32
    return %c0_i32, %c0_i32_0 : i32, i32
  }
  func.func @transform_7(%arg0: i32) -> (i32, i32) {
    %c0_i32 = arith.constant 0 : i32
    %c0_i32_0 = arith.constant 0 : i32
    %c0_i32_1 = arith.constant 0 : i32
    return %c0_i32, %c0_i32_0 : i32, i32
  }
  func.func @transform_8(%arg0: i32) -> (i32, i32) {
    %c0_i32 = arith.constant 0 : i32
    %c0_i32_0 = arith.constant 0 : i32
    %c0_i32_1 = arith.constant 0 : i32
    return %c0_i32, %c0_i32_0 : i32, i32
  }
  func.func @transform_9(%arg0: i32) -> (i32, i32) {
    %c0_i32 = arith.constant 0 : i32
    %c0_i32_0 = arith.constant 0 : i32
    %c0_i32_1 = arith.constant 0 : i32
    return %c0_i32, %c0_i32_0 : i32, i32
  }
  func.func @transform_10(%arg0: i32) -> (i32, i32) {
    %c0_i32 = arith.constant 0 : i32
    %c0_i32_0 = arith.constant 0 : i32
    %c0_i32_1 = arith.constant 0 : i32
    return %c0_i32, %c0_i32_0 : i32, i32
  }
  func.func @transform_11(%arg0: i32) -> (i32, i32) {
    %c0_i32 = arith.constant 0 : i32
    %c0_i32_0 = arith.constant 0 : i32
    %c0_i32_1 = arith.constant 0 : i32
    return %c0_i32, %c0_i32_0 : i32, i32
  }
  func.func @transform_12(%arg0: i32) -> (i32, i32, i32, i32) {
    %c0_i32 = arith.constant 0 : i32
    %c0_i32_0 = arith.constant 0 : i32
    %c0_i32_1 = arith.constant 0 : i32
    %c0_i32_2 = arith.constant 0 : i32
    return %arg0, %c0_i32, %c0_i32_0, %c0_i32_1 : i32, i32, i32, i32
  }
}

</mosaic_0001>

<bundles_post_ra>
// kernel: ti_fused_mbconv_forward.1
= control target key start
LH: loop header
LB: loop body
LE: loop exit
PB: predicated region body
PF: predicated region fallthrough
CT: control target
= control target key end

     0   :  { %s2511_s21 = smov 0   ;;  %s3281_s0 = inlined_call_operand.vmem [shape: f32[2,16,256], index: 0, kind: input, shape index: {}]   ;;  %s3282_s1 = inlined_call_operand.vmem [shape: f32[9,256], index: 1, kind: input, shape index: {}]   ;;  %s3283_s2 = inlined_call_operand.vmem [shape: f32[4,16], index: 2, kind: input, shape index: {}]   ;;  %s3284_s3 = inlined_call_operand.vmem [shape: f32[4,1], index: 3, kind: input, shape index: {}]   ;;  %s3285_s4 = inlined_call_operand.vmem [shape: f32[4,4], index: 4, kind: input, shape index: {}]   ;;  %s3286_s5 = inlined_call_operand.vmem [shape: f32[4,1], index: 5, kind: input, shape index: {}]   ;;  %s3287_s6 = inlined_call_operand.vmem [shape: f32[4,4], index: 6, kind: input, shape index: {}]   ;;  %s3288_s7 = inlined_call_operand.vmem [shape: f32[4,1], index: 7, kind: input, shape index: {}]   ;;  %s3289_s8 = inlined_call_operand.vmem [shape: f32[24,36], index: 8, kind: input, shape index: {}]   ;;  %s3290_s9 = inlined_call_operand.vmem [shape: f32[24,1], index: 9, kind: input, shape index: {}]   ;;  %s3291_s10 = inlined_call_operand.vmem [shape: f32[4,24], index: 10, kind: input, shape index: {}]   ;;  %s3292_s11 = inlined_call_operand.vmem [shape: f32[4,1], index: 11, kind: input, shape index: {}]   ;;  %s3293_s12 = inlined_call_operand.vmem [shape: f32[2,4,4,256], index: 12, kind: output, shape index: {}]  }
   0x1 LB: > { %s2282_s22 = sadd.s32 4294967295, %s2434_s21   ;;  %p2286_p0 = scmp.ge.s32.totalorder %s2434_s21, 1  ;;  %s2434_s21 = sphi %s2511_s21, %s22_s21  }
   0x2   : > { %p362_p1 = scmp.lt.s32.totalorder %s2434_s21, 3 }
   0x4   : > { %p363_p2 = pnand %p2286_p0, %p362_p1 }
   0x5   : > { %p404_p3 = scmp.lt.s32.totalorder (!%p363_p2), %s2282_s22, 1  ;;  %s2437_s26 = smov (!%p363_p2), 17  }
   0x6   : > { %366 = sbr.rel (%p363_p2) target bundleno = 1518 (0x5ee), region = 68  ;;  %s2438_s27 = smov (!%p363_p2), 16  }
   0x7   : > { %s2439_s14 = smov (!%p363_p2), 15   ;;  %s2440_s17 = smov (!%p363_p2), 1  }
   0x8   : > { %s2441_s18 = smov (!%p363_p2), 127   ;;  %s2442_s30 = smov (!%p363_p2), 113  }
   0x9   : > { %s2443_s16 = smov (!%p363_p2), 112   ;;  %s2444_s19 = smov (!%p363_p2), 111  }
   0xb   : > { %v2436_v0 = vmov 0   ;;  %v419_v1 = vld [vmem:[%s3284_s3] sm:$0xf]  ;;  %s3313_s22 = smov (!%p404_p3, %s2282_s22), 1  ;;  %vm425_vm0 = vcmask 130048   ;;  %vm482_vm1 = vcmask 1043456  }
   0xc   : > { %2402 = vset.pattern.permute.xlu0 %v2436_v0  ;;  %2403 = vset.pattern.permute.xlu1 %v2436_v0  ;;  %s2382_s25 = sshll.u32 %s3313_s22, 5  ;;  %v418_v6 = vld [vmem:[%s3283_s2] sm:$0xf]  ;;  %vm478_vm2 = vcmask 31744  }
   0xd   : > { %422 = vperm.xlu0 %2402, %v419_v1   ;;  %2404 = vset.pattern.permute.xlu2 %v2436_v0  ;;  %s408_s28 = scalar_lea.vmem %s3281_s0, %s2382_s25  ;;  %v472_v7 = vld [vmem:[%s3286_s5] sm:$0xf]  ;;  %v2311_v62 = vld [vmem:[%s3282_s1 + $0x7] ss:$8 sm:$0x3] }
   0xe   : > { %v2530_v2 = vld [vmem:[%s408_s28 + $0x10] sm:$0xff]  ;;  %v2532_v3 = vld [vmem:[%s408_s28 + $0x18] sm:$0xff]  ;;  %v2534_v4 = vld [vmem:[%s408_s28] sm:$0xff]  ;;  %v952_v1 = vperm.slane %v2311_v62, 1 }
   0xf   : > { %443 = vmatpush.msra.mxu0 %v2530_v2  ;;  %463 = vmatpush.msra.mxu1 %v2532_v3  ;;  %v2538_v5 = vld [vmem:[%s408_s28 + $0x8] sm:$0xff]  ;;  %v471_v15 = vld [vmem:[%s3285_s4] sm:$0xf]  ;;  %v2312_v63 = vld [vmem:[%s3282_s1 + $0x10] ss:$8 sm:$0x3] }
  0x10   : > { %v646_v61 = vld [vmem:[%s3288_s7] sm:$0xf]  ;;  %v980_v0 = vperm.slane %v2312_v63, 1  ;;  %955 = vrot.lane.b32.xlu2 %v952_v1, %s2438_s27 }
  0x11   : > { %444 = vmatpush.msra.mxu0 %v2534_v4  ;;  %464 = vmatpush.msra.mxu1 %v2538_v5 }
  0x12   : > { %2291 = vmatmul.msk.f32.vlgmr.msra.gmra.mxu0 %vm425_vm0, %v418_v6  ;;  %2292 = vmatmul.msk.f32.vlgmr.msra.gmra.mxu1 %vm425_vm0, %v418_v6 }
  0x13   : > { %649 = vperm.xlu1 %2403, %v646_v61  }
  0x15   : > { %475 = vperm.xlu0 %2402, %v472_v7   ;;  %v951_v7 = vperm.slane %v2311_v62, 0  ;;  %v2305_v62 = vld [vmem:[%s3282_s1 + $0x1] ss:$8 sm:$0x3] }
  0x1b   : > { %953 = vrot.lane.b32.xlu1 %v951_v7, %s2438_s27  ;;  %v645_v7 = vld [vmem:[%s3287_s6] sm:$0xf] }
  0x1d   : > { %983 = vrot.lane.b32.xlu0 %v980_v0, %s2437_s26 }
  0x7f   : > { %v423_v8 = vpop.permute.xlu0 %422 }
  0x87   : > { %v476_v16 = vpop.permute.xlu0 %475 }
  0x8f   : > { %v446_v9 = vpop.f32.mrf.mxu0  ;;  %v466_v10 = vpop.f32.mrf.mxu1 }
  0x90   : > { %v447_v11 = vadd.f32 %v446_v9, %v423_v8  ;;  %v467_v12 = vadd.f32 %v466_v10, %v423_v8  ;;  %v2579_v10 = vld [vmem:[%s3282_s1 + $0x6] ss:$8 sm:$0x3] }
  0x92   : > { %v469_v13 = vmax.f32 %v447_v11, 0.0  ;;  %v470_v14 = vmax.f32 %v467_v12, 0.0 }
  0x94   : > { %2293 = vmatpush.msk.msra.mxu2 %vm482_vm1, %v469_v13  ;;  %2295 = vmatpush.msk.msra.mxu3 %vm482_vm1, %v470_v14 }
  0x95   : > { %2294 = vmatmul.msk.f32.vlgmr.msra.gmra.mxu2 %vm478_vm2, %v471_v15  ;;  %2296 = vmatmul.msk.f32.vlgmr.msra.gmra.mxu3 %vm478_vm2, %v471_v15  ;;  %v925_v15 = vperm.slane %v2579_v10, 0 }
  0x97   : > { %927 = vrot.lane.b32.xlu0 %v925_v15, %s2439_s14  ;;  %v2635_v15 = vpop.permute.xlu2 %955 }
 0x118   : > { %v506_v17 = vpop.f32.mrf.mxu2  ;;  %v526_v18 = vpop.f32.mrf.mxu3 }
 0x119   : > { %v507_v19 = vadd.f32 %v506_v17, %v476_v16  ;;  %v527_v20 = vadd.f32 %v526_v18, %v476_v16  ;;  %v979_v16 = vperm.slane %v2312_v63, 0 }
 0x11b   : > { %v2297_v21 = vmul.f32 -1.442695, %v507_v19  ;;  %v2298_v22 = vmul.f32 -1.442695, %v527_v20  ;;  %981 = vrot.lane.b32.xlu2 %v979_v16, %s2437_s26  ;;  %v650_v16 = vpop.permute.xlu1 %649 }
 0x11c   : > { %v2309_v20 = vld [vmem:[%s3282_s1 + $0x5] ss:$8 sm:$0x3] }
 0x11d   : > { %2405 = vpow2.f32 %v2297_v21 }
 0x11e   : > { %2407 = vpow2.f32 %v2298_v22 }
 0x123   : > { %v2406_v23 = vpop.eup %2405 }
 0x124   : > { %v2408_v24 = vpop.eup %2407  ;;  %v535_v25 = vadd.f32 1.0, %v2406_v23 }
 0x125   : > { %v536_v26 = vadd.f32 1.0, %v2408_v24 }
 0x126   : > { %2409 = vrcp.f32 %v535_v25  ;;  %v548_v32 = vand.u32 2147483648, %v535_v25  ;;  %v546_v35 = vand.u32 2147483647, %v535_v25  ;;  %vm542_vm5 = vweird.f32 %v535_v25 }
 0x127   : > { %2411 = vrcp.f32 %v536_v26  ;;  %v563_v36 = vand.u32 2147483648, %v536_v26  ;;  %v561_v38 = vand.u32 2147483647, %v536_v26  ;;  %vm557_vm7 = vweird.f32 %v536_v26 }
 0x128   : > { %v549_v40 = vor.u32 1.1754944e-38, %v548_v32  ;;  %vm547_vm8 = vcmp.eq.f32.partialorder %v546_v35, 8.507059e+37 }
 0x129   : > { %v564_v43 = vor.u32 1.1754944e-38, %v563_v36  ;;  %vm562_vm10 = vcmp.eq.f32.partialorder %v561_v38, 8.507059e+37 }
 0x12c   : > { %v2410_v27 = vpop.eup %2409 }
 0x12d   : > { %v2412_v28 = vpop.eup %2411  ;;  %v538_v29 = vmul.f32 %v2410_v27, %v535_v25  ;;  %vm543_vm3 = vweird.f32 %v2410_v27 }
 0x12e   : > { %v553_v30 = vmul.f32 %v2412_v28, %v536_v26  ;;  %vm558_vm4 = vweird.f32 %v2412_v28  ;;  %vm544_vm6 = vmor %vm542_vm5, %vm543_vm3  ;;  %v897_v26 = vperm.slane %v2309_v20, 0 }
 0x12f   : > { %v539_v31 = vsub.f32 1.0, %v538_v29  ;;  %vm559_vm9 = vmor %vm557_vm7, %vm558_vm4  ;;  %v2307_v29 = vld [vmem:[%s3282_s1 + $0x3] ss:$8 sm:$0x3] }
 0x130   : > { %v554_v33 = vsub.f32 1.0, %v553_v30  ;;  %899 = vrot.lane.b32.xlu1 %v897_v26, %s2440_s17  ;;  %v857_v35 = vperm.slane %v2307_v29, 1  ;;  %v856_v63 = vperm.slane %v2307_v29, 0 }
 0x131   : > { %v540_v34 = vmul.f32 %v2410_v27, %v539_v31 }
 0x132   : > { %v555_v37 = vmul.f32 %v2412_v28, %v554_v33  ;;  %860 = vrot.lane.b32.xlu0 %v857_v35, %s2441_s18 }
 0x133   : > { %v541_v39 = vadd.f32 %v2410_v27, %v540_v34 }
 0x134   : > { %v556_v41 = vadd.f32 %v2412_v28, %v555_v37 }
 0x135   : > { %v545_v42 = vsel %vm544_vm6, %v2410_v27, %v541_v39  ;;  %v898_v39 = vperm.slane %v2309_v20, 1 }
 0x136   : > { %v2557_v44 = vsel %vm547_vm8, %v549_v40, %v545_v42  ;;  %v560_v45 = vsel %vm559_vm9, %v2412_v28, %v556_v41 }
 0x137   : > { %v567_v46 = vsel %vm482_vm1, %v2557_v44, 0.0  ;;  %v2561_v47 = vsel %vm562_vm10, %v564_v43, %v560_v45  ;;  %901 = vrot.lane.b32.xlu2 %v898_v39, %s2440_s17 }
 0x138   : > { %v568_v48 = vrot.slane %v567_v46, 4  ;;  %v574_v49 = vsel %vm482_vm1, %v2561_v47, 0.0 }
 0x139   : > { %v575_v50 = vrot.slane %v574_v49, 4 }
 0x13a   : > { %v569_v51 = vadd.f32 %v568_v48, %v567_v46  ;;  %v926_v48 = vperm.slane %v2579_v10, 1  ;;  %v769_v10 = vld [vmem:[%s3282_s1] ss:$8 sm:$0x3] }
 0x13b   : > { %v576_v52 = vadd.f32 %v575_v50, %v574_v49 }
 0x13c   : > { %v570_v53 = vrot.slane %v569_v51, 2  ;;  %929 = vrot.lane.b32.xlu1 %v926_v48, %s2439_s14 }
 0x13d   : > { %v577_v54 = vrot.slane %v576_v52, 2 }
 0x13e   : > { %v571_v55 = vadd.f32 %v570_v53, %v569_v51  ;;  %v2306_v51 = vld [vmem:[%s3282_s1 + $0x2] ss:$8 sm:$0x3] }
 0x13f   : > { %v578_v56 = vadd.f32 %v577_v54, %v576_v52  ;;  %858 = vrot.lane.b32.xlu2 %v856_v63, %s2441_s18 }
 0x140   : > { %v572_v57 = vrot.slane %v571_v55, 1 }
 0x141   : > { %v579_v58 = vrot.slane %v578_v56, 1 }
 0x142   : > { %v573_v59 = vadd.f32 %v572_v57, %v571_v55 }
 0x143   : > { %v580_v60 = vadd.f32 %v579_v58, %v578_v56 }
 0x144   : > { %2413 = vrcp.f32 %v573_v59  ;;  %v592_v13 = vand.u32 2147483648, %v573_v59  ;;  %v590_v18 = vand.u32 2147483647, %v573_v59  ;;  %vm586_vm13 = vweird.f32 %v573_v59 }
 0x145   : > { %2415 = vrcp.f32 %v580_v60  ;;  %v606_v19 = vand.u32 2147483648, %v580_v60  ;;  %v604_v22 = vand.u32 2147483647, %v580_v60  ;;  %vm600_vm15 = vweird.f32 %v580_v60 }
 0x146   : > { %v593_v24 = vor.u32 1.1754944e-38, %v592_v13  ;;  %vm591_vm3 = vcmp.eq.f32.partialorder %v590_v18, 8.507059e+37  ;;  %v829_v13 = vperm.slane %v2306_v51, 1 }
 0x147   : > { %v607_v28 = vor.u32 1.1754944e-38, %v606_v19  ;;  %vm605_vm5 = vcmp.eq.f32.partialorder %v604_v22, 8.507059e+37 }
 0x14a   : > { %v2414_v6 = vpop.eup %2413 }
 0x14b   : > { %v2416_v8 = vpop.eup %2415  ;;  %v582_v9 = vmul.f32 %v2414_v6, %v573_v59  ;;  %vm587_vm11 = vweird.f32 %v2414_v6  ;;  %v828_v59 = vperm.slane %v2306_v51, 0 }
 0x14c   : > { %v596_v11 = vmul.f32 %v2416_v8, %v580_v60  ;;  %vm601_vm12 = vweird.f32 %v2416_v8  ;;  %vm588_vm14 = vmor %vm586_vm13, %vm587_vm11  ;;  %vm789_vm13 = vcmask 138240  }
 0x14d   : > { %v583_v12 = vsub.f32 1.0, %v582_v9  ;;  %vm602_vm4 = vmor %vm600_vm15, %vm601_vm12  ;;  %v799_v9 = vperm.slane %v2305_v62, 0  ;;  %830 = vrot.lane.b32.xlu0 %v828_v59, %s2442_s30  ;;  %vm777_vm15 = vcmask 908288  }
 0x14e   : > { %v597_v14 = vsub.f32 1.0, %v596_v11  ;;  %v772_v11 = vperm.slane %v769_v10, 1 }
 0x14f   : > { %v584_v17 = vmul.f32 %v2414_v6, %v583_v12  ;;  %801 = vrot.lane.b32.xlu1 %v799_v9, %s2443_s16  ;;  %v800_v12 = vperm.slane %v2305_v62, 1 }
 0x150   : > { %v598_v21 = vmul.f32 %v2416_v8, %v597_v14  ;;  %v771_v14 = vperm.slane %v769_v10, 0 }
 0x151   : > { %v585_v23 = vadd.f32 %v2414_v6, %v584_v17  ;;  %803 = vrot.lane.b32.xlu2 %v800_v12, %s2443_s16 }
 0x152   : > { %v599_v25 = vadd.f32 %v2416_v8, %v598_v21 }
 0x153   : > { %v589_v27 = vsel %vm588_vm14, %v2414_v6, %v585_v23  ;;  %vm846_vm14 = vcmask 121856  }
 0x154   : > { %v594_v30 = vsel %vm591_vm3, %v593_v24, %v589_v27  ;;  %v603_v31 = vsel %vm602_vm4, %v2416_v8, %v599_v25  ;;  %v2639_v24 = vpop.permute.xlu0 %983  ;;  %v2641_v25 = vpop.permute.xlu1 %953  ;;  %vm834_vm3 = vcmask 924672   ;;  %vm876_vm4 = vcmask 7168  }
 0x155   : > { %v609_v32 = vmul.f32 %v594_v30, %v2557_v44  ;;  %v608_v33 = vsel %vm605_vm5, %v607_v28, %v603_v31  ;;  %775 = vrot.lane.b32.xlu0 %v772_v11, %s2444_s19  ;;  %vm862_vm5 = vcmask 1039360  }
 0x156   : > { %v610_v34 = vmul.f32 %v608_v33, %v2561_v47 }
 0x157   : > { %v611_v36 = vperm.slane %v609_v32, 0  ;;  %v615_v37 = vperm.slane %v609_v32, 1  ;;  %v633_v38 = vperm.slane %v609_v32, 3  ;;  %v627_v45 = vperm.slane %v609_v32, 2  ;;  %832 = vrot.lane.b32.xlu1 %v829_v13, %s2442_s30 }
 0x158   : > { %v612_v40 = vperm.slane %v610_v34, 0  ;;  %v616_v41 = vperm.slane %v610_v34, 1  ;;  %v634_v42 = vperm.slane %v610_v34, 3  ;;  %v628_v44 = vperm.slane %v610_v34, 2 }
 0x159   : > { %v617_v43 = vmul.f32 %v615_v37, %v2534_v4  ;;  %v613_v47 = vmul.f32 %v611_v36, %v2534_v4  ;;  %v635_v50 = vmul.f32 %v633_v38, %v2530_v2  ;;  %v629_v56 = vmul.f32 %v627_v45, %v2530_v2  ;;  %773 = vrot.lane.b32.xlu2 %v771_v14, %s2444_s19 }
 0x15a   : > { %v618_v46 = vmul.f32 %v616_v41, %v2538_v5  ;;  %v614_v52 = vmul.f32 %v612_v40, %v2538_v5  ;;  %v636_v54 = vmul.f32 %v634_v42, %v2532_v3  ;;  %v630_v58 = vmul.f32 %v628_v44, %v2532_v3 }
 0x15b   : > { %v621_v49 = vrot.slane %v617_v43, 4  ;;  %v639_v61 = vrot.slane %v635_v50, 4  ;;  %v2445_v32 = vmov 0.0  }
 0x15c   : > { %v622_v53 = vrot.slane %v618_v46, 4  ;;  %v640_v1 = vrot.slane %v636_v54, 4  ;;  %v2645_v31 = vpop.permute.xlu0 %927  ;;  %749 = vst [vmem:[#allocation2 + $0x10] sm:$0xff] %v2445_v32 }
 0x15d   : > { %v625_v55 = vadd.f32 %v621_v49, %v613_v47  ;;  %747 = vst [vmem:[#allocation2] sm:$0xff] %v2445_v32 }
 0x15e   : > { %v626_v57 = vadd.f32 %v622_v53, %v614_v52  ;;  %748 = vst [vmem:[#allocation2 + $0x8] sm:$0xff] %v2445_v32 }
 0x15f   : > { %v631_v60 = vadd.f32 %v629_v56, %v625_v55  ;;  %750 = vst [vmem:[#allocation2 + $0x18] sm:$0xff] %v2445_v32 }
 0x160   : > { %v632_v0 = vadd.f32 %v630_v58, %v626_v57  ;;  %751 = vst [vmem:[#allocation2 + $0x20] sm:$0xff] %v2445_v32 }
 0x161   : > { %v2612_v6 = vadd.f32 %v639_v61, %v631_v60  ;;  %752 = vst [vmem:[#allocation2 + $0x28] sm:$0xff] %v2445_v32 }
 0x162   : > { %v2617_v8 = vadd.f32 %v640_v1, %v632_v0  ;;  %753 = vst [vmem:[#allocation2 + $0x30] sm:$0xff] %v2445_v32 }
 0x163   : > { %2299 = vmatpush.msk.msrb.mxu2 %vm482_vm1, %v2612_v6  ;;  %754 = vst [vmem:[#allocation2 + $0x38] sm:$0xff] %v2445_v32 }
 0x164   : > { %2301 = vmatpush.msk.msrb.mxu3 %vm482_vm1, %v2617_v8  ;;  %2300 = vmatmul.msk.f32.vlgmr.msrb.gmra.mxu2 %vm478_vm2, %v645_v7  ;;  %755 = vst [vmem:[#allocation2 + $0x40] sm:$0xf] %v2445_v32 }
 0x165   : > { %2302 = vmatmul.msk.f32.vlgmr.msrb.gmra.mxu3 %vm478_vm2, %v645_v7  ;;  %756 = vst [vmem:[#allocation2 + $0x48] sm:$0xf] %v2445_v32 }
 0x175   : > { %v2637_v23 = vpop.permute.xlu2 %981 }
 0x191   : > { %v2643_v30 = vpop.permute.xlu2 %901 }
 0x199   : > { %v2649_v43 = vpop.permute.xlu2 %858 }
 0x1a2   : > { %v2647_v34 = vpop.permute.xlu1 %899 }
 0x1a4   : > { %v2651_v45 = vpop.permute.xlu0 %860 }
 0x1ab   : > { %v2657_v14 = vpop.permute.xlu2 %803 }
 0x1ae   : > { %v930_v55 = vpop.permute.xlu1 %929 }
 0x1e7   : > { %v678_v17 = vpop.f32.mrf.mxu2 }
 0x1e8   : > { %v679_v18 = vadd.f32 %v678_v17, %v650_v16  ;;  %v698_v19 = vpop.f32.mrf.mxu3 }
 0x1e9   : > { %v699_v20 = vadd.f32 %v698_v19, %v650_v16  ;;  %v831_v16 = vpop.permute.xlu0 %830 }
 0x1ea   : > { %v2303_v21 = vmul.f32 -1.442695, %v679_v18 }
 0x1eb   : > { %v2304_v22 = vmul.f32 -1.442695, %v699_v20 }
 0x1ec   : > { %2417 = vpow2.f32 %v2303_v21 }
 0x1ed   : > { %2419 = vpow2.f32 %v2304_v22 }
 0x1f2   : > { %v2418_v26 = vpop.eup %2417 }
 0x1f3   : > { %v2420_v27 = vpop.eup %2419  ;;  %v707_v28 = vadd.f32 1.0, %v2418_v26 }
 0x1f4   : > { %v708_v29 = vadd.f32 1.0, %v2420_v27 }
 0x1f5   : > { %2421 = vrcp.f32 %v707_v28  ;;  %v720_v39 = vand.u32 2147483648, %v707_v28  ;;  %v718_v42 = vand.u32 2147483647, %v707_v28  ;;  %vm714_vm7 = vweird.f32 %v707_v28 }
 0x1f6   : > { %2423 = vrcp.f32 %v708_v29  ;;  %v735_v44 = vand.u32 2147483648, %v708_v29  ;;  %v733_v47 = vand.u32 2147483647, %v708_v29  ;;  %vm729_vm9 = vweird.f32 %v708_v29 }
 0x1f7   : > { %v721_v49 = vor.u32 1.1754944e-38, %v720_v39  ;;  %vm719_vm10 = vcmp.eq.f32.partialorder %v718_v42, 8.507059e+37 }
 0x1f8   : > { %v736_v54 = vor.u32 1.1754944e-38, %v735_v44  ;;  %vm734_vm12 = vcmp.eq.f32.partialorder %v733_v47, 8.507059e+37 }
 0x1fb   : > { %v2422_v33 = vpop.eup %2421 }
 0x1fc   : > { %v2424_v35 = vpop.eup %2423  ;;  %v710_v36 = vmul.f32 %v2422_v33, %v707_v28  ;;  %vm715_vm2 = vweird.f32 %v2422_v33 }
 0x1fd   : > { %v725_v37 = vmul.f32 %v2424_v35, %v708_v29  ;;  %vm730_vm6 = vweird.f32 %v2424_v35  ;;  %vm716_vm8 = vmor %vm714_vm7, %vm715_vm2  ;;  %vm805_vm2 = vcmask 916480   ;;  %vm3299_vm7 = vcmask 904192  }
 0x1fe   : > { %v711_v38 = vsub.f32 1.0, %v710_v36  ;;  %vm731_vm11 = vmor %vm729_vm9, %vm730_vm6  ;;  %vm3295_vm6 = vcmask 1043576   ;;  %vm3294_vm9 = vcmask 1043592  }
 0x1ff   : > { %v726_v40 = vsub.f32 1.0, %v725_v37 }
 0x200   : > { %v712_v41 = vmul.f32 %v2422_v33, %v711_v38 }
 0x201   : > { %v727_v46 = vmul.f32 %v2424_v35, %v726_v40  ;;  %v2674_v40 = vpop.permute.xlu1 %801 }
 0x202   : > { %v713_v48 = vadd.f32 %v2422_v33, %v712_v41 }
 0x203   : > { %v728_v50 = vadd.f32 %v2424_v35, %v727_v46 }
 0x204   : > { %v717_v51 = vsel %vm716_vm8, %v2422_v33, %v713_v48  ;;  %vm3297_vm8 = vcmask 920576  }
 0x205   : > { %v722_v52 = vsel %vm719_vm10, %v721_v49, %v717_v51  ;;  %v732_v53 = vsel %vm731_vm11, %v2424_v35, %v728_v50  ;;  %v985_v50 = vsel %vm789_vm13, %v2637_v23, %v2639_v24  ;;  %v2308_v51 = vld [vmem:[%s3282_s1 + $0x4] ss:$8 sm:$0x3]  ;;  %v774_v24 = vpop.permute.xlu2 %773  ;;  %vm974_vm10 = vcmask 916484  }
 0x206   : > { %v757_v56 = vperm.slane %v722_v52, 0  ;;  %v761_v57 = vsub.f32 1.0, %v722_v52  ;;  %v1162_v58 = vperm.slane %v722_v52, 1  ;;  %v1521_v59 = vperm.slane %v722_v52, 2 }
 0x207   : > { %v1868_v60 = vperm.slane %v722_v52, 3  ;;  %v737_v61 = vsel %vm734_vm12, %v736_v54, %v732_v53  ;;  %vm920_vm11 = vcmask 1039364   ;;  %vm3298_vm12 = vcmask 1047564  }
 0x208   : > { %v763_v62 = vperm.slane %v761_v57, 0  ;;  %v1166_v63 = vperm.slane %v761_v57, 1  ;;  %v759_v0 = vmul.f32 %v757_v56, %v2534_v4  ;;  %v1164_v1 = vmul.f32 %v1162_v58, %v2534_v4 }
 0x209   : > { %v1525_v7 = vperm.slane %v761_v57, 2  ;;  %v1872_v9 = vperm.slane %v761_v57, 3  ;;  %v758_v12 = vperm.slane %v737_v61, 0  ;;  %v762_v13 = vsub.f32 1.0, %v737_v61  ;;  %v776_v57 = vpop.permute.xlu0 %775 }
 0x20a   : > { %v765_v10 = vmul.f32 %v763_v62, %v2612_v6  ;;  %v1168_v11 = vmul.f32 %v1166_v63, %v2612_v6  ;;  %v1523_v17 = vmul.f32 %v1521_v59, %v2530_v2  ;;  %v1870_v19 = vmul.f32 %v1868_v60, %v2530_v2  ;;  %v833_v63 = vpop.permute.xlu1 %832 }
 0x20b   : > { %v1527_v18 = vmul.f32 %v1525_v7, %v2612_v6  ;;  %v1874_v20 = vmul.f32 %v1872_v9, %v2612_v6  ;;  %v764_v22 = vperm.slane %v762_v13, 0  ;;  %v1522_v26 = vperm.slane %v737_v61, 2 }
 0x20c   : > { %v2663_v4 = vadd.f32 %v765_v10, %v759_v0  ;;  %v1172_v21 = vrot.slane %v1168_v11, 4  ;;  %v1163_v29 = vperm.slane %v737_v61, 1  ;;  %v1167_v32 = vperm.slane %v762_v13, 1 }
 0x20d   : > { %v2665_v27 = vadd.f32 %v1527_v18, %v1523_v17  ;;  %v1878_v28 = vrot.slane %v1874_v20, 4  ;;  %v760_v35 = vmul.f32 %v758_v12, %v2538_v5  ;;  %v766_v36 = vmul.f32 %v764_v22, %v2617_v8 }
 0x20e   : > { %v2667_v33 = vadd.f32 %v1172_v21, %v1164_v1  ;;  %v1526_v37 = vperm.slane %v762_v13, 2  ;;  %v1169_v6 = vmul.f32 %v1167_v32, %v2617_v8  ;;  %v1869_v38 = vperm.slane %v737_v61, 3 }
 0x20f   : > { %v2671_v2 = vadd.f32 %v1878_v28, %v1870_v19  ;;  %v1873_v39 = vperm.slane %v762_v13, 3  ;;  %v2676_v41 = vadd.f32 %v766_v36, %v760_v35  ;;  %v1524_v42 = vmul.f32 %v1522_v26, %v2532_v3  ;;  %v2328_v36 = vld [vmem:[%s3282_s1 + $0x6] ss:$8 sm:$0x3] }
 0x210   : > { %v1528_v46 = vmul.f32 %v1526_v37, %v2617_v8  ;;  %v988_v44 = vmul.f32 %v2637_v23, %v2663_v4  ;;  %v1165_v48 = vmul.f32 %v1163_v29, %v2538_v5  ;;  %v1173_v47 = vrot.slane %v1169_v6, 4 }
 0x211   : > { %v1875_v49 = vmul.f32 %v1873_v39, %v2617_v8  ;;  %v989_v53 = vmul.f32 %v985_v50, %v2676_v41  ;;  %v1871_v5 = vmul.f32 %v1869_v38, %v2532_v3  ;;  %v931_v8 = vsel %vm846_vm14, %v2645_v31, %v930_v55  ;;  %v2324_v39 = vld [vmem:[%s3282_s1 + $0x2] ss:$8 sm:$0x3]  ;;  %v2325_v50 = vld [vmem:[%s3282_s1 + $0x3] ss:$8 sm:$0x3] }
 0x212   : > { %v2690_v52 = vadd.f32 %v1528_v46, %v1524_v42  ;;  %992 = vrot.lane.b32.xlu2 %v988_v44, %s2444_s19  ;;  %v2694_v54 = vadd.f32 %v1173_v47, %v1165_v48  ;;  %v935_v23 = vmul.f32 %v931_v8, %v2676_v41  ;;  %v886_v58 = vperm.slane %v2308_v51, 0  ;;  %v2327_v46 = vld [vmem:[%s3282_s1 + $0x5] ss:$8 sm:$0x3] }
 0x213   : > { %v1879_v56 = vrot.slane %v1875_v49, 4  ;;  %994 = vrot.lane.b32.xlu1 %v989_v53, %s2444_s19  ;;  %v887_v59 = vperm.slane %v2308_v51, 1  ;;  %v778_v61 = vsel %vm777_vm15, %v774_v24, %v776_v57  ;;  %v934_v3 = vmul.f32 %v2645_v31, %v2663_v4  ;;  %v1178_v48 = vld [vmem:[%s3282_s1] ss:$8 sm:$0x3]  ;;  %v745_v24 = vld [vmem:[%s3290_s9 + $0x10] sm:$0xff] }
 0x214   : > { %940 = vrot.lane.b32.xlu0 %v935_v23, %s2442_s30  ;;  %v890_v55 = vmul.f32 %v886_v58, %v2663_v4  ;;  %v781_v0 = vmul.f32 %v778_v61, %v2663_v4  ;;  %v839_v1 = vmul.f32 %v833_v63, %v2676_v41  ;;  %v957_v31 = vsel %vm425_vm0, %v2641_v25, %v2635_v15 }
 0x215   : > { %v2701_v60 = vadd.f32 %v1879_v56, %v1871_v5  ;;  %v891_v62 = vmul.f32 %v887_v59, %v2676_v41  ;;  %v835_v7 = vsel %vm834_vm3, %v831_v16, %v833_v63  ;;  %v961_v9 = vmul.f32 %v957_v31, %v2676_v41  ;;  %v2323_v56 = vld [vmem:[%s3282_s1 + $0x1] ss:$8 sm:$0x3] }
 0x216   : > { %892 = vst [vmem:[#allocation2 + $0x20] sm:$0xf] %v890_v55  ;;  %v960_v10 = vmul.f32 %v2641_v25, %v2663_v4  ;;  %v838_v11 = vmul.f32 %v835_v7, %v2663_v4  ;;  %v867_v17 = vmul.f32 %v2651_v45, %v2676_v41  ;;  %v903_v15 = vsel %vm876_vm4, %v2647_v34, %v2643_v30  ;;  %v743_v59 = vld [vmem:[%s3290_s9] sm:$0xff] }
 0x217   : > { %893 = vst [vmem:[#allocation2 + $0x28] sm:$0xf] %v891_v62  ;;  %v965_v12 = vrot.slane %v961_v9, 4  ;;  %v907_v16 = vmul.f32 %v903_v15, %v2676_v41  ;;  %v906_v25 = vmul.f32 %v2647_v34, %v2663_v4  ;;  %v863_v20 = vsel %vm862_vm5, %v2649_v43, %v2651_v45  ;;  %v2330_v43 = vld [vmem:[%s3282_s1 + $0x10] ss:$8 sm:$0x3] }
 0x218   : > { %v964_v13 = vrot.slane %v960_v10, 4  ;;  %v871_v18 = vrot.slane %v867_v17, 4  ;;  %v806_v30 = vsel %vm805_vm2, %v2674_v40, %v2657_v14  ;;  %v866_v22 = vmul.f32 %v863_v20, %v2663_v4 }
 0x219   : > { %v911_v19 = vrot.slane %v907_v16, 4  ;;  %v910_v21 = vrot.slane %v906_v25, 4  ;;  %v809_v34 = vmul.f32 %v806_v30, %v2663_v4  ;;  %v782_v26 = vmul.f32 %v776_v57, %v2676_v41  ;;  %v744_v57 = vld [vmem:[%s3290_s9 + $0x8] sm:$0xff] }
 0x21a   : > { %938 = vrot.lane.b32.xlu2 %v934_v3, %s2442_s30  ;;  %v870_v28 = vrot.slane %v866_v22, 4  ;;  %v810_v29 = vmul.f32 %v2657_v14, %v2676_v41  ;;  %v1370_v32 = vperm.slane %v2330_v43, 0  ;;  %v1371_v4 = vperm.slane %v2330_v43, 1  ;;  %v2329_v14 = vld [vmem:[%s3282_s1 + $0x7] ss:$8 sm:$0x3] }
 0x21b   : > { %785 = vrot.lane.b32.xlu1 %v781_v0, %s2437_s26  ;;  %v813_v45 = vrot.slane %v809_v34, 4  ;;  %v1321_v37 = vperm.slane %v2328_v36, 1  ;;  %v1320_v6 = vperm.slane %v2328_v36, 0  ;;  %v1346_v38 = vperm.slane %v2329_v14, 0 }
 0x21c   : > { %844 = vrot.lane.b32.xlu0 %v839_v1, %s2439_s14  ;;  %v814_v35 = vrot.slane %v810_v29, 4  ;;  %v1230_v40 = vperm.slane %v2324_v39, 0  ;;  %v1347_v41 = vperm.slane %v2329_v14, 1  ;;  %v1231_v42 = vperm.slane %v2324_v39, 1 }
 0x21d   : > { %v1297_v44 = vperm.slane %v2327_v46, 1  ;;  %v1296_v47 = vperm.slane %v2327_v46, 0  ;;  %v1180_v49 = vperm.slane %v1178_v48, 0  ;;  %v1256_v51 = vperm.slane %v2325_v50, 0 }
 0x21e   : > { %v1181_v53 = vperm.slane %v1178_v48, 1  ;;  %v1257_v5 = vperm.slane %v2325_v50, 1  ;;  %v1207_v8 = vperm.slane %v2323_v56, 1  ;;  %v1206_v23 = vperm.slane %v2323_v56, 0 }
 0x21f   : > { %v2326_v25 = vld [vmem:[%s3282_s1 + $0x4] ss:$8 sm:$0x3] }
 0x220   : > { %v1280_v30 = vperm.slane %v2326_v25, 0 }
 0x222   : > { %842 = vrot.lane.b32.xlu2 %v838_v11, %s2439_s14 }
 0x223   : > { %968 = vrot.lane.b32.xlu1 %v965_v12, %s2443_s16 }
 0x224   : > { %966 = vrot.lane.b32.xlu0 %v964_v13, %s2443_s16 }
 0x22a   : > { %874 = vrot.lane.b32.xlu2 %v871_v18, %s2440_s17  ;;  %v1281_v18 = vperm.slane %v2326_v25, 1 }
 0x22b   : > { %914 = vrot.lane.b32.xlu1 %v911_v19, %s2441_s18 }
 0x22c   : > { %912 = vrot.lane.b32.xlu0 %v910_v21, %s2441_s18  ;;  %v1285_v22 = vmul.f32 %v1281_v18, %v2694_v54 }
 0x22e   : > { %v1289_v43 = vrot.slane %v1285_v22, 4 }
 0x232   : > { %787 = vrot.lane.b32.xlu2 %v782_v26, %s2437_s26 }
 0x233   : > { %872 = vrot.lane.b32.xlu1 %v870_v28, %s2440_s17  ;;  %v1284_v28 = vmul.f32 %v1280_v30, %v2667_v33 }
 0x234   : > { %815 = vrot.lane.b32.xlu0 %v813_v45, %s2438_s27 }
 0x23a   : > { %1372 = vrot.lane.b32.xlu2 %v1370_v32, %s2437_s26 }
 0x23b   : > { %817 = vrot.lane.b32.xlu1 %v814_v35, %s2438_s27  ;;  %v1288_v35 = vrot.slane %v1284_v28, 4 }
 0x23c   : > { %1374 = vrot.lane.b32.xlu0 %v1371_v4, %s2437_s26 }
 0x242   : > { %1324 = vrot.lane.b32.xlu2 %v1321_v37, %s2439_s14 }
 0x243   : > { %1322 = vrot.lane.b32.xlu1 %v1320_v6, %s2439_s14 }
 0x244   : > { %1348 = vrot.lane.b32.xlu0 %v1346_v38, %s2438_s27 }
 0x24a   : > { %1232 = vrot.lane.b32.xlu2 %v1230_v40, %s2442_s30  ;;  %v2828_v40 = vld [vmem:[%s3289_s8] sm:$0xff] }
 0x24b   : > { %1350 = vrot.lane.b32.xlu1 %v1347_v41, %s2438_s27 }
 0x24c   : > { %1234 = vrot.lane.b32.xlu0 %v1231_v42, %s2442_s30 }
 0x252   : > { %1300 = vrot.lane.b32.xlu2 %v1297_v44, %s2440_s17 }
 0x253   : > { %1298 = vrot.lane.b32.xlu1 %v1296_v47, %s2440_s17 }
 0x254   : > { %1182 = vrot.lane.b32.xlu0 %v1180_v49, %s2444_s19  ;;  %v2835_v49 = vld [vmem:[%s3289_s8 + $0x8] sm:$0xff] }
 0x25a   : > { %1258 = vrot.lane.b32.xlu2 %v1256_v51, %s2441_s18 }
 0x25b   : > { %1184 = vrot.lane.b32.xlu1 %v1181_v53, %s2444_s19 }
 0x25c   : > { %1260 = vrot.lane.b32.xlu0 %v1257_v5, %s2441_s18 }
 0x262   : > { %1210 = vrot.lane.b32.xlu2 %v1207_v8, %s2443_s16 }
 0x263   : > { %1208 = vrot.lane.b32.xlu1 %v1206_v23, %s2443_s16  ;;  %v2848_v23 = vld [vmem:[%s3289_s8 + $0x10] sm:$0xff] }
 0x264   : > { %1024 = vperm.xlu0 %2402, %v745_v24  }
 0x26b   : > { %1019 = vperm.xlu1 %2403, %v744_v57  }
 0x26c   : > { %v993_v58 = vpop.permute.xlu2 %992 }
 0x273   : > { %1014 = vperm.xlu1 %2403, %v743_v59  }
 0x274   : > { %v939_v61 = vpop.permute.xlu2 %938 }
 0x27c   : > { %v843_v3 = vpop.permute.xlu2 %842 }
 0x27d   : > { %851 = vst.msk [vmem:[#allocation2 + $0x10] sm:$0xf] %vm3295_vm6, %v843_v3  ;;  %vm1027_vm6 = vcmask 293888  }
 0x284   : > { %v875_v55 = vpop.permute.xlu2 %874 }
 0x285   : > { %v995_v62 = vpop.permute.xlu1 %994 }
 0x286   : > { %v996_v63 = vsel %vm777_vm15, %v993_v58, %v995_v62  ;;  %1001 = vst.msk [vmem:[#allocation2 + $0x48] sm:$0xf] %vm3299_vm7, %v995_v62  ;;  %v941_v0 = vpop.permute.xlu0 %940 }
 0x287   : > { %999 = vst [vmem:[#allocation2 + $0x40] sm:$0xf] %v996_v63  ;;  %v942_v1 = vsel %vm834_vm3, %v939_v61, %v941_v0 }
 0x288   : > { %947 = vst.msk [vmem:[#allocation2 + $0x38] sm:$0xf] %vm3297_vm8, %v941_v0 }
 0x289   : > { %945 = vst [vmem:[#allocation2 + $0x30] sm:$0xf] %v942_v1 }
 0x28c   : > { %v788_v31 = vpop.permute.xlu2 %787 }
 0x28d   : > { %v786_v7 = vpop.permute.xlu1 %785  ;;  %v1011_v9 = vld [vmem:[#allocation2 + $0x48] sm:$0xf] }
 0x28e   : > { %v790_v10 = vsel %vm789_vm13, %v786_v7, %v788_v31  ;;  %794 = vst.msk [vmem:[#allocation2] sm:$0xf] %vm3294_vm9, %v786_v7  ;;  %2317 = vmatpush.msk.msrb.mxu1 %vm482_vm1, %v1011_v9  ;;  %v1010_v11 = vld [vmem:[#allocation2 + $0x40] sm:$0xf]  ;;  %v845_v12 = vpop.permute.xlu0 %844  ;;  %vm3296_vm9 = vcmask 1047684  }
 0x28f   : > { %795 = vst [vmem:[#allocation2 + $0x8] sm:$0xf] %v790_v10  ;;  %2313 = vmatpush.msk.msrb.mxu0 %vm482_vm1, %v1010_v11  ;;  %v847_v13 = vsel %vm846_vm14, %v843_v3, %v845_v12 }
 0x290   : > { %852 = vst [vmem:[#allocation2 + $0x18] sm:$0xf] %v847_v13 }
 0x294   : > { %v2819_v32 = vpop.permute.xlu2 %1372 }
 0x295   : > { %v969_v17 = vpop.permute.xlu1 %968  ;;  %v1379_v13 = vmul.f32 %v2819_v32, %v2667_v33 }
 0x296   : > { %975 = vst.msk [vmem:[#allocation2 + $0x38] sm:$0xf0] %vm974_vm10, %v969_v17  ;;  %v967_v15 = vpop.permute.xlu0 %966 }
 0x297   : > { %v970_v16 = vsel %vm805_vm2, %v967_v15, %v969_v17  ;;  %v1383_v25 = vrot.slane %v1379_v13, 4  ;;  %v2345_v13 = vld [vmem:[%s3282_s1 + $0x4] ss:$8 sm:$0x3] }
 0x298   : > { %973 = vst [vmem:[#allocation2 + $0x30] sm:$0xf0] %v970_v16 }
 0x29c   : > { %v1325_v42 = vpop.permute.xlu2 %1324 }
 0x29d   : > { %v915_v19 = vpop.permute.xlu1 %914  ;;  %v1009_v20 = vld [vmem:[#allocation2 + $0x38] sm:$0xff] }
 0x29e   : > { %921 = vst.msk [vmem:[#allocation2 + $0x28] sm:$0xf0] %vm920_vm11, %v915_v19  ;;  %1081 = vmatpush.msrb.mxu1 %v1009_v20  ;;  %v913_v21 = vpop.permute.xlu0 %912 }
 0x29f   : > { %v916_v34 = vsel %vm862_vm5, %v913_v21, %v915_v19  ;;  %v1008_v26 = vld [vmem:[#allocation2 + $0x30] sm:$0xff] }
 0x2a0   : > { %919 = vst [vmem:[#allocation2 + $0x20] sm:$0xf0] %v916_v34  ;;  %1055 = vmatpush.msrb.mxu0 %v1008_v26 }
 0x2a4   : > { %v1233_v51 = vpop.permute.xlu2 %1232 }
 0x2a5   : > { %v1007_v45 = vld [vmem:[#allocation2 + $0x28] sm:$0xff]  ;;  %v873_v29 = vpop.permute.xlu1 %872 }
 0x2a6   : > { %1293 = vst [vmem:[#allocation2 + $0x28] sm:$0xf] %v1289_v43  ;;  %1082 = vmatpush.msrb.mxu1 %v1007_v45  ;;  %v816_v4 = vpop.permute.xlu0 %815  ;;  %v877_v36 = vsel %vm876_vm4, %v873_v29, %v875_v55 }
 0x2a7   : > { %881 = vst.msk [vmem:[#allocation2 + $0x10] sm:$0xf0] %vm3298_vm12, %v873_v29  ;;  %v1006_v37 = vld [vmem:[#allocation2 + $0x20] sm:$0xff] }
 0x2a8   : > { %823 = vst.msk [vmem:[#allocation2] sm:$0xf0] %vm3296_vm9, %v816_v4  ;;  %1056 = vmatpush.msrb.mxu0 %v1006_v37 }
 0x2a9   : > { %1292 = vst [vmem:[#allocation2 + $0x20] sm:$0xf] %v1288_v35 }
 0x2aa   : > { %882 = vst [vmem:[#allocation2 + $0x18] sm:$0xf0] %v877_v36  ;;  %v2348_v36 = vld [vmem:[%s3282_s1 + $0x7] ss:$8 sm:$0x3] }
 0x2ab   : > { %v1694_v37 = vperm.slane %v2348_v36, 1 }
 0x2ac   : > { %v1301_v24 = vpop.permute.xlu2 %1300 }
 0x2ad   : > { %v818_v14 = vpop.permute.xlu1 %817 }
 0x2ae   : > { %v819_v6 = vsel %vm425_vm0, %v816_v4, %v818_v14  ;;  %v1004_v38 = vld [vmem:[#allocation2 + $0x10] sm:$0xff]  ;;  %v1375_v39 = vpop.permute.xlu0 %1374 }
 0x2af   : > { %824 = vst [vmem:[#allocation2 + $0x8] sm:$0xf0] %v819_v6  ;;  %1057 = vmatpush.msrb.mxu0 %v1004_v38  ;;  %v1002_v41 = vld [vmem:[#allocation2] sm:$0xff]  ;;  %v1376_v61 = vsel %vm789_vm13, %v2819_v32, %v1375_v39  ;;  %v2349_v14 = vld [vmem:[%s3282_s1 + $0x10] ss:$8 sm:$0x3] }
 0x2b0   : > { %v1380_v62 = vmul.f32 %v1376_v61, %v2694_v54  ;;  %v1693_v6 = vperm.slane %v2348_v36, 0  ;;  %v1720_v39 = vperm.slane %v2349_v14, 1 }
 0x2b1   : > { %v1005_v46 = vld [vmem:[#allocation2 + $0x18] sm:$0xff]  ;;  %1058 = vmatpush.msrb.mxu0 %v1002_v41 }
 0x2b2   : > { %1083 = vmatpush.msrb.mxu1 %v1005_v46  ;;  %2314 = vmatmul.msk.f32.vlgmr.msrb.gmra.mxu0 %vm1027_vm6, %v2828_v40  ;;  %v1384_v63 = vrot.slane %v1380_v62, 4 }
 0x2b4   : > { %v1259_v0 = vpop.permute.xlu2 %1258 }
 0x2b5   : > { %v1323_v44 = vpop.permute.xlu1 %1322 }
 0x2b6   : > { %v1003_v48 = vld [vmem:[#allocation2 + $0x8] sm:$0xff]  ;;  %v1349_v47 = vpop.permute.xlu0 %1348  ;;  %v1326_v1 = vsel %vm846_vm14, %v1323_v44, %v1325_v42  ;;  %v1329_v12 = vmul.f32 %v1323_v44, %v2667_v33 }
 0x2b7   : > { %1084 = vmatpush.msrb.mxu1 %v1003_v48  ;;  %v1355_v50 = vmul.f32 %v1349_v47, %v2667_v33  ;;  %v1330_v11 = vmul.f32 %v1326_v1, %v2694_v54  ;;  %v2347_v42 = vld [vmem:[%s3282_s1 + $0x6] ss:$8 sm:$0x3]  ;;  %v2344_v44 = vld [vmem:[%s3282_s1 + $0x3] ss:$8 sm:$0x3] }
 0x2b8   : > { %2318 = vmatmul.msk.f32.vlgmr.msrb.gmra.mxu1 %vm1027_vm6, %v2828_v40  ;;  %v1333_v16 = vrot.slane %v1329_v12, 4  ;;  %v1670_v46 = vperm.slane %v2347_v42, 1  ;;  %v1669_v48 = vperm.slane %v2347_v42, 0 }
 0x2b9   : > { %1359 = vrot.lane.b32.xlu2 %v1355_v50, %s2443_s16  ;;  %v1334_v17 = vrot.slane %v1330_v11, 4  ;;  %v2342_v50 = vld [vmem:[%s3282_s1 + $0x1] ss:$8 sm:$0x3] }
 0x2ba   : > { %2315 = vmatmul.msk.f32.gmra.mxu0 %vm1027_vm6, %v2835_v49 }
 0x2bc   : > { %v1211_v43 = vpop.permute.xlu2 %1210 }
 0x2bd   : > { %v1351_v53 = vpop.permute.xlu1 %1350  ;;  %v1216_v4 = vmul.f32 %v1211_v43, %v2694_v54 }
 0x2be   : > { %v1352_v5 = vsel %vm425_vm0, %v1349_v47, %v1351_v53  ;;  %v1235_v56 = vpop.permute.xlu0 %1234  ;;  %v1607_v47 = vperm.slane %v2344_v44, 0  ;;  %v1608_v53 = vperm.slane %v2344_v44, 1 }
 0x2bf   : > { %v1356_v8 = vmul.f32 %v1352_v5, %v2694_v54  ;;  %v1236_v18 = vsel %vm834_vm3, %v1233_v51, %v1235_v56  ;;  %v1240_v19 = vmul.f32 %v1235_v56, %v2694_v54  ;;  %v1557_v51 = vperm.slane %v2342_v50, 0  ;;  %v2343_v56 = vld [vmem:[%s3282_s1 + $0x2] ss:$8 sm:$0x3] }
 0x2c0   : > { %2319 = vmatmul.msk.f32.gmra.mxu1 %vm1027_vm6, %v2835_v49  ;;  %v1239_v21 = vmul.f32 %v1236_v18, %v2667_v33  ;;  %v1558_v5 = vperm.slane %v2342_v50, 1  ;;  %v1634_v18 = vperm.slane %v2345_v13, 1 }
 0x2c1   : > { %1361 = vrot.lane.b32.xlu0 %v1356_v8, %s2443_s16  ;;  %v1244_v22 = vrot.slane %v1240_v19, 4  ;;  %v1584_v8 = vperm.slane %v2343_v56, 1 }
 0x2c2   : > { %2316 = vmatmul.msk.f32.gmra.mxu0 %vm1027_vm6, %v2848_v23  ;;  %v1243_v34 = vrot.slane %v1239_v21, 4 }
 0x2c5   : > { %v1299_v57 = vpop.permute.xlu1 %1298 }
 0x2c6   : > { %v1302_v58 = vsel %vm876_vm4, %v1299_v57, %v1301_v24  ;;  %v1305_v59 = vmul.f32 %v1299_v57, %v2667_v33  ;;  %v1183_v3 = vpop.permute.xlu0 %1182  ;;  %v1531_v24 = vld [vmem:[%s3282_s1] ss:$8 sm:$0x3]  ;;  %v1583_v57 = vperm.slane %v2343_v56, 0 }
 0x2c7   : > { %v1306_v55 = vmul.f32 %v1302_v58, %v2694_v54  ;;  %v1533_v58 = vperm.slane %v1531_v24, 0 }
 0x2c8   : > { %2320 = vmatmul.msk.f32.gmra.mxu1 %vm1027_vm6, %v2848_v23  ;;  %1309 = vrot.lane.b32.xlu2 %v1305_v59, %s2441_s18  ;;  %v1534_v59 = vperm.slane %v1531_v24, 1 }
 0x2c9   : > { %1311 = vrot.lane.b32.xlu0 %v1306_v55, %s2441_s18 }
 0x2cd   : > { %v1185_v15 = vpop.permute.xlu1 %1184 }
 0x2ce   : > { %v1261_v31 = vpop.permute.xlu0 %1260  ;;  %v1186_v20 = vsel %vm777_vm15, %v1183_v3, %v1185_v15  ;;  %v1190_v29 = vmul.f32 %v1185_v15, %v2694_v54 }
 0x2cf   : > { %v1262_v7 = vsel %vm862_vm5, %v1259_v0, %v1261_v31  ;;  %v1266_v9 = vmul.f32 %v1261_v31, %v2694_v54  ;;  %v1189_v30 = vmul.f32 %v1186_v20, %v2667_v33  ;;  %v2346_v54 = vld [vmem:[%s3282_s1 + $0x5] ss:$8 sm:$0x3]  ;;  %v1633_v20 = vperm.slane %v2345_v13, 0 }
 0x2d0   : > { %1387 = vrot.lane.b32.xlu2 %v1384_v63, %s2444_s19  ;;  %v1265_v10 = vmul.f32 %v1262_v7, %v2667_v33  ;;  %v1194_v35 = vrot.slane %v1190_v29, 4  ;;  %v1643_v38 = vperm.slane %v2346_v54, 0  ;;  %v1644_v41 = vperm.slane %v2346_v54, 1 }
 0x2d1   : > { %1271 = vrot.lane.b32.xlu1 %v1266_v9, %s2440_s17  ;;  %v1193_v28 = vrot.slane %v1189_v30, 4 }
 0x2d2   : > { %1269 = vrot.lane.b32.xlu0 %v1265_v10, %s2440_s17 }
 0x2d5   : > { %v1209_v26 = vpop.permute.xlu1 %1208 }
 0x2d6   : > { %v1212_v45 = vsel %vm805_vm2, %v1209_v26, %v1211_v43  ;;  %v2936_v62 = vpop.permute.xlu0 %1024 }
 0x2d7   : > { %v1215_v32 = vmul.f32 %v1212_v45, %v2667_v33  ;;  %v1719_v33 = vperm.slane %v2349_v14, 0  ;;  %v1637_v45 = vmul.f32 %v1633_v20, %v2665_v27 }
 0x2d8   : > { %1337 = vrot.lane.b32.xlu2 %v1334_v17, %s2442_s30 }
 0x2d9   : > { %1335 = vrot.lane.b32.xlu1 %v1333_v16, %s2442_s30 }
 0x2da   : > { %1385 = vrot.lane.b32.xlu0 %v1383_v25, %s2444_s19 }
 0x2dd   : > { %v2940_v0 = vpop.permute.xlu1 %1019 }
 0x2e0   : > { %1247 = vrot.lane.b32.xlu2 %v1244_v22, %s2439_s14 }
 0x2e1   : > { %1245 = vrot.lane.b32.xlu1 %v1243_v34, %s2439_s14 }
 0x2e2   : > { %1195 = vrot.lane.b32.xlu0 %v1193_v28, %s2437_s26  ;;  %v1638_v28 = vmul.f32 %v1634_v18, %v2690_v52 }
 0x2e5   : > { %v2950_v17 = vpop.permute.xlu1 %1014 }
 0x2e8   : > { %1219 = vrot.lane.b32.xlu2 %v1215_v32, %s2438_s27 }
 0x2e9   : > { %1197 = vrot.lane.b32.xlu1 %v1194_v35, %s2437_s26 }
 0x2ea   : > { %1221 = vrot.lane.b32.xlu0 %v1216_v4, %s2438_s27 }
 0x2f0   : > { %1697 = vrot.lane.b32.xlu2 %v1694_v37, %s2438_s27 }
 0x2f1   : > { %1695 = vrot.lane.b32.xlu1 %v1693_v6, %s2438_s27 }
 0x2f2   : > { %1721 = vrot.lane.b32.xlu0 %v1719_v33, %s2437_s26 }
 0x2f8   : > { %1645 = vrot.lane.b32.xlu2 %v1643_v38, %s2440_s17 }
 0x2f9   : > { %1723 = vrot.lane.b32.xlu1 %v1720_v39, %s2437_s26 }
 0x2fa   : > { %1647 = vrot.lane.b32.xlu0 %v1644_v41, %s2440_s17 }
 0x300   : > { %1673 = vrot.lane.b32.xlu2 %v1670_v46, %s2439_s14  ;;  %v2971_v46 = vld [vmem:[%s3291_s10] sm:$0xf] }
 0x301   : > { %1671 = vrot.lane.b32.xlu1 %v1669_v48, %s2439_s14 }
 0x302   : > { %1609 = vrot.lane.b32.xlu0 %v1607_v47, %s2441_s18 }
 0x308   : > { %1559 = vrot.lane.b32.xlu2 %v1557_v51, %s2443_s16 }
 0x309   : > { %1611 = vrot.lane.b32.xlu1 %v1608_v53, %s2441_s18 }
 0x30a   : > { %1561 = vrot.lane.b32.xlu0 %v1558_v5, %s2443_s16 }
 0x310   : > { %1587 = vrot.lane.b32.xlu2 %v1584_v8, %s2442_s30 }
 0x311   : > { %1585 = vrot.lane.b32.xlu1 %v1583_v57, %s2442_s30 }
 0x312   : > { %1535 = vrot.lane.b32.xlu0 %v1533_v58, %s2444_s19 }
 0x313   : > { %v1360_v61 = vpop.permute.xlu2 %1359 }
 0x319   : > { %1537 = vrot.lane.b32.xlu1 %v1534_v59, %s2444_s19 }
 0x322   : > { %v1310_v3 = vpop.permute.xlu2 %1309 }
 0x32a   : > { %v2934_v55 = vpop.permute.xlu2 %1387 }
 0x32b   : > { %1393 = vst.msk [vmem:[#allocation2 + $0x48] sm:$0xf] %vm3299_vm7, %v2934_v55 }
 0x32f   : > { %v1060_v63 = vpop.f32.mrf.mxu0 }
 0x330   : > { %v1061_v21 = vadd.f32 %v1060_v63, %v2950_v17 }
 0x332   : > { %v1338_v1 = vpop.permute.xlu2 %1337  ;;  %v1095_v29 = vmax.f32 %v1061_v21, 0.0  ;;  %v1403_v8 = vld [vmem:[#allocation2 + $0x48] sm:$0xf] }
 0x333   : > { %1343 = vst.msk [vmem:[#allocation2 + $0x38] sm:$0xf] %vm3297_vm8, %v1338_v1  ;;  %v1362_v31 = vpop.permute.xlu0 %1361  ;;  %vm3300_vm8 = vcmask 1043576  }
 0x334   : > { %v1363_v7 = vsel %vm805_vm2, %v1360_v61, %v1362_v31  ;;  %1367 = vst.msk [vmem:[#allocation2 + $0x38] sm:$0xf0] %vm974_vm10, %v1362_v31  ;;  %v1101_v39 = vmin.f32 %v1095_v29, 6.0 }
 0x335   : > { %1366 = vst [vmem:[#allocation2 + $0x30] sm:$0xf0] %v1363_v7  ;;  %v1086_v9 = vpop.f32.mrf.mxu1 }
 0x336   : > { %v1087_v6 = vadd.f32 %v1086_v9, %v2950_v17 }
 0x337   : > { %v1063_v10 = vpop.f32.mrf.mxu0 }
 0x338   : > { %v1064_v25 = vadd.f32 %v1063_v10, %v2940_v0  ;;  %v1096_v44 = vmax.f32 %v1087_v6, 0.0 }
 0x33a   : > { %v2945_v11 = vpop.permute.xlu2 %1247  ;;  %v1097_v22 = vmax.f32 %v1064_v25, 0.0  ;;  %v1102_v5 = vmin.f32 %v1096_v44, 6.0 }
 0x33b   : > { %v1312_v12 = vpop.permute.xlu0 %1311  ;;  %v1401_v24 = vld [vmem:[#allocation2 + $0x38] sm:$0xff] }
 0x33c   : > { %v1313_v15 = vsel %vm862_vm5, %v1310_v3, %v1312_v12  ;;  %1317 = vst.msk [vmem:[#allocation2 + $0x28] sm:$0xf0] %vm920_vm11, %v1312_v12  ;;  %v1103_v33 = vmin.f32 %v1097_v22, 6.0 }
 0x33d   : > { %1316 = vst [vmem:[#allocation2 + $0x20] sm:$0xf0] %v1313_v15  ;;  %v1089_v16 = vpop.f32.mrf.mxu1 }
 0x33e   : > { %v1090_v32 = vadd.f32 %v1089_v16, %v2940_v0 }
 0x33f   : > { %v1066_v19 = vpop.f32.mrf.mxu0 }
 0x340   : > { %v1067_v30 = vadd.f32 %v1066_v19, %v2936_v62  ;;  %v1098_v41 = vmax.f32 %v1090_v32, 0.0 }
 0x342   : > { %v1099_v34 = vmax.f32 %v1067_v30, 0.0  ;;  %v2957_v26 = vpop.permute.xlu2 %1219  ;;  %v1104_v47 = vmin.f32 %v1098_v41, 6.0 }
 0x343   : > { %1226 = vst.msk [vmem:[#allocation2] sm:$0xf0] %vm3296_vm9, %v2957_v26  ;;  %v1399_v43 = vld [vmem:[#allocation2 + $0x28] sm:$0xff]  ;;  %v1272_v4 = vpop.permute.xlu1 %1271  ;;  %vm1112_vm9 = vcmask 195584  }
 0x344   : > { %v1105_v35 = vmin.f32 %v1099_v34, 6.0  ;;  %1640 = vst [vmem:[#allocation2 + $0x28] sm:$0xf] %v1638_v28  ;;  %v1398_v36 = vld [vmem:[#allocation2 + $0x20] sm:$0xff]  ;;  %v1270_v37 = vpop.permute.xlu0 %1269 }
 0x345   : > { %v1092_v14 = vpop.f32.mrf.mxu1  ;;  %1639 = vst [vmem:[#allocation2 + $0x20] sm:$0xf] %v1637_v45  ;;  %v1273_v54 = vsel %vm876_vm4, %v1270_v37, %v1272_v4 }
 0x346   : > { %1276 = vst.msk [vmem:[#allocation2 + $0x10] sm:$0xf0] %vm3298_vm12, %v1270_v37  ;;  %v1093_v38 = vadd.f32 %v1092_v14, %v2936_v62  ;;  %1129 = vmatpush.msra.mxu2 %v1105_v35  ;;  %vm3301_vm12 = vcmask 1043592  }
 0x347   : > { %1277 = vst [vmem:[#allocation2 + $0x18] sm:$0xf0] %v1273_v54 }
 0x348   : > { %v1100_v42 = vmax.f32 %v1093_v38, 0.0  ;;  %1130 = vmatpush.msra.mxu2 %v1103_v33 }
 0x34a   : > { %v1106_v48 = vmin.f32 %v1100_v42, 6.0  ;;  %1131 = vmatpush.msra.mxu2 %v1101_v39 }
 0x34b   : > { %2321 = vmatmul.msk.f32.vlgmr.msra.gmra.mxu2 %vm1112_vm9, %v2971_v46  ;;  %v1336_v50 = vpop.permute.xlu1 %1335 }
 0x34c   : > { %1149 = vmatpush.msra.mxu3 %v1106_v48  ;;  %v1339_v51 = vsel %vm834_vm3, %v1336_v50, %v1338_v1  ;;  %v1386_v53 = vpop.permute.xlu0 %1385 }
 0x34d   : > { %1342 = vst [vmem:[#allocation2 + $0x30] sm:$0xf] %v1339_v51  ;;  %v1389_v56 = vsel %vm777_vm15, %v1386_v53, %v2934_v55  ;;  %v1698_v55 = vpop.permute.xlu2 %1697 }
 0x34e   : > { %1150 = vmatpush.msra.mxu3 %v1104_v47  ;;  %1392 = vst [vmem:[#allocation2 + $0x40] sm:$0xf] %v1389_v56 }
 0x350   : > { %1151 = vmatpush.msra.mxu3 %v1102_v5 }
 0x351   : > { %2322 = vmatmul.msk.f32.vlgmr.msra.gmra.mxu3 %vm1112_vm9, %v2971_v46 }
 0x352   : > { %2335 = vmatpush.msk.msrb.mxu3 %vm482_vm1, %v1403_v8 }
 0x353   : > { %v1246_v57 = vpop.permute.xlu1 %1245 }
 0x354   : > { %1448 = vmatpush.msrb.mxu3 %v1401_v24  ;;  %v1249_v58 = vsel %vm846_vm14, %v1246_v57, %v2945_v11  ;;  %1252 = vst.msk [vmem:[#allocation2 + $0x10] sm:$0xf] %vm3300_vm8, %v1246_v57  ;;  %v1196_v59 = vpop.permute.xlu0 %1195  ;;  %v1400_v3 = vld [vmem:[#allocation2 + $0x30] sm:$0xff]  ;;  %vm3302_vm8 = vcmask 1047564  }
 0x355   : > { %1253 = vst [vmem:[#allocation2 + $0x18] sm:$0xf] %v1249_v58  ;;  %v1402_v61 = vld [vmem:[#allocation2 + $0x40] sm:$0xf]  ;;  %v1646_v13 = vpop.permute.xlu2 %1645 }
 0x356   : > { %1449 = vmatpush.msrb.mxu3 %v1399_v43  ;;  %1202 = vst.msk [vmem:[#allocation2] sm:$0xf] %vm3301_vm12, %v1196_v59  ;;  %2331 = vmatpush.msk.msrb.mxu2 %vm482_vm1, %v1402_v61  ;;  %v1652_v51 = vmul.f32 %v1646_v13, %v2665_v27 }
 0x358   : > { %1422 = vmatpush.msrb.mxu2 %v1400_v3  ;;  %v1656_v24 = vrot.slane %v1652_v51, 4 }
 0x35a   : > { %1423 = vmatpush.msrb.mxu2 %v1398_v36 }
 0x35b   : > { %v1198_v63 = vpop.permute.xlu1 %1197  ;;  %v1396_v1 = vld [vmem:[#allocation2 + $0x10] sm:$0xff] }
 0x35c   : > { %v1199_v31 = vsel %vm789_vm13, %v1196_v59, %v1198_v63  ;;  %v1222_v7 = vpop.permute.xlu0 %1221  ;;  %1424 = vmatpush.msrb.mxu2 %v1396_v1  ;;  %v1397_v9 = vld [vmem:[#allocation2 + $0x18] sm:$0xff] }
 0x35d   : > { %1203 = vst [vmem:[#allocation2 + $0x8] sm:$0xf] %v1199_v31  ;;  %v1223_v10 = vsel %vm425_vm0, %v2957_v26, %v1222_v7  ;;  %1450 = vmatpush.msrb.mxu3 %v1397_v9  ;;  %v1394_v11 = vld [vmem:[#allocation2] sm:$0xff]  ;;  %v1674_v30 = vpop.permute.xlu2 %1673  ;;  %v2368_v31 = vld [vmem:[%s3282_s1 + $0x10] ss:$8 sm:$0x3] }
 0x35e   : > { %1227 = vst [vmem:[#allocation2 + $0x8] sm:$0xf0] %v1223_v10  ;;  %1425 = vmatpush.msrb.mxu2 %v1394_v11  ;;  %v2077_v7 = vperm.slane %v2368_v31, 1  ;;  %v2076_v10 = vperm.slane %v2368_v31, 0 }
 0x35f   : > { %2332 = vmatmul.msk.f32.vlgmr.msrb.gmra.mxu2 %vm1027_vm6, %v2828_v40 }
 0x363   : > { %v1696_v12 = vpop.permute.xlu1 %1695 }
 0x364   : > { %v1722_v15 = vpop.permute.xlu0 %1721  ;;  %v1699_v22 = vsel %vm425_vm0, %v1696_v12, %v1698_v55  ;;  %v1702_v36 = vmul.f32 %v1696_v12, %v2665_v27 }
 0x365   : > { %v1728_v16 = vmul.f32 %v1722_v15, %v2665_v27  ;;  %v1395_v25 = vld [vmem:[#allocation2 + $0x8] sm:$0xff]  ;;  %v1703_v34 = vmul.f32 %v1699_v22, %v2690_v52  ;;  %v1560_v4 = vpop.permute.xlu2 %1559 }
 0x366   : > { %1451 = vmatpush.msrb.mxu3 %v1395_v25  ;;  %v1706_v6 = vrot.slane %v1702_v36, 4 }
 0x367   : > { %1732 = vrot.lane.b32.xlu0 %v1728_v16, %s2444_s19  ;;  %2333 = vmatmul.msk.f32.gmra.mxu2 %vm1027_vm6, %v2835_v49  ;;  %v1707_v45 = vrot.slane %v1703_v34, 4  ;;  %v2365_v16 = vld [vmem:[%s3282_s1 + $0x5] ss:$8 sm:$0x3] }
 0x368   : > { %2336 = vmatmul.msk.f32.vlgmr.msrb.gmra.mxu3 %vm1027_vm6, %v2828_v40  ;;  %v2003_v22 = vperm.slane %v2365_v16, 1  ;;  %v2363_v34 = vld [vmem:[%s3282_s1 + $0x3] ss:$8 sm:$0x3] }
 0x36b   : > { %v1724_v18 = vpop.permute.xlu1 %1723 }
 0x36c   : > { %v1725_v19 = vsel %vm789_vm13, %v1722_v15, %v1724_v18  ;;  %v1648_v21 = vpop.permute.xlu0 %1647  ;;  %v2362_v15 = vld [vmem:[%s3282_s1 + $0x2] ss:$8 sm:$0x3]  ;;  %v2002_v18 = vperm.slane %v2365_v16, 0 }
 0x36d   : > { %v1729_v20 = vmul.f32 %v1725_v19, %v2690_v52  ;;  %v1649_v32 = vsel %vm876_vm4, %v1646_v13, %v1648_v21  ;;  %v1588_v41 = vpop.permute.xlu2 %1587  ;;  %v1937_v25 = vperm.slane %v2362_v15, 1  ;;  %v1936_v19 = vperm.slane %v2362_v15, 0 }
 0x36e   : > { %v1653_v37 = vmul.f32 %v1649_v32, %v2690_v52  ;;  %v1593_v48 = vmul.f32 %v1588_v41, %v2690_v52 }
 0x36f   : > { %2334 = vmatmul.msk.f32.gmra.mxu2 %vm1027_vm6, %v2848_v23  ;;  %1734 = vrot.lane.b32.xlu2 %v1729_v20, %s2444_s19  ;;  %v1884_v20 = vld [vmem:[%s3282_s1] ss:$8 sm:$0x3] }
 0x370   : > { %2337 = vmatmul.msk.f32.gmra.mxu3 %vm1027_vm6, %v2835_v49  ;;  %v1657_v33 = vrot.slane %v1653_v37, 4  ;;  %v1886_v21 = vperm.slane %v1884_v20, 0 }
 0x373   : > { %v1672_v26 = vpop.permute.xlu1 %1671 }
 0x374   : > { %v1675_v28 = vsel %vm846_vm14, %v1672_v26, %v1674_v30  ;;  %v1678_v43 = vmul.f32 %v1672_v26, %v2665_v27  ;;  %v1610_v35 = vpop.permute.xlu0 %1609  ;;  %v1887_v30 = vperm.slane %v1884_v20, 1  ;;  %v2361_v26 = vld [vmem:[%s3282_s1 + $0x1] ss:$8 sm:$0x3] }
 0x375   : > { %v1679_v29 = vmul.f32 %v1675_v28, %v2690_v52  ;;  %v1963_v28 = vperm.slane %v2363_v34, 1 }
 0x376   : > { %1682 = vrot.lane.b32.xlu0 %v1678_v43, %s2442_s30  ;;  %v1912_v43 = vperm.slane %v2361_v26, 0 }
 0x377   : > { %1710 = vrot.lane.b32.xlu2 %v1707_v45, %s2443_s16  ;;  %1684 = vrot.lane.b32.xlu1 %v1679_v29, %s2442_s30  ;;  %v1962_v45 = vperm.slane %v2363_v34, 0  ;;  %v1913_v29 = vperm.slane %v2361_v26, 1 }
 0x378   : > { %2338 = vmatmul.msk.f32.gmra.mxu3 %vm1027_vm6, %v2848_v23 }
 0x37b   : > { %v1612_v14 = vpop.permute.xlu1 %1611 }
 0x37c   : > { %v1613_v54 = vsel %vm862_vm5, %v1610_v35, %v1612_v14  ;;  %v1562_v39 = vpop.permute.xlu0 %1561  ;;  %v1617_v5 = vmul.f32 %v1612_v14, %v2690_v52 }
 0x37d   : > { %v1616_v38 = vmul.f32 %v1613_v54, %v2665_v27  ;;  %v1563_v59 = vsel %vm805_vm2, %v1560_v4, %v1562_v39  ;;  %v1567_v3 = vmul.f32 %v1562_v39, %v2690_v52  ;;  %v3086_v4 = vld [vmem:[%s3282_s1 + $0x4] ss:$8 sm:$0x3] }
 0x37e   : > { %v1621_v58 = vrot.slane %v1617_v5, 4  ;;  %v1566_v61 = vmul.f32 %v1563_v59, %v2665_v27 }
 0x37f   : > { %1660 = vrot.lane.b32.xlu2 %v1657_v33, %s2441_s18  ;;  %1708 = vrot.lane.b32.xlu1 %v1706_v6, %s2443_s16  ;;  %v1620_v47 = vrot.slane %v1616_v38, 4  ;;  %v1571_v63 = vrot.slane %v1567_v3, 4  ;;  %v1987_v6 = vperm.slane %v3086_v4, 1 }
 0x380   : > { %v1570_v55 = vrot.slane %v1566_v61, 4 }
 0x381   : > { %v1991_v54 = vmul.f32 %v1987_v6, %v2701_v60 }
 0x383   : > { %v1586_v42 = vpop.permute.xlu1 %1585 }
 0x384   : > { %v1589_v44 = vsel %vm834_vm3, %v1586_v42, %v1588_v41  ;;  %v1536_v53 = vpop.permute.xlu0 %1535  ;;  %v1995_v42 = vrot.slane %v1991_v54, 4 }
 0x385   : > { %v1592_v50 = vmul.f32 %v1589_v44, %v2665_v27 }
 0x387   : > { %1598 = vrot.lane.b32.xlu1 %v1593_v48, %s2439_s14  ;;  %1622 = vrot.lane.b32.xlu2 %v1620_v47, %s2440_s17 }
 0x388   : > { %1596 = vrot.lane.b32.xlu0 %v1592_v50, %s2439_s14 }
 0x38b   : > { %v1538_v56 = vpop.permute.xlu1 %1537 }
 0x38c   : > { %v1539_v8 = vsel %vm777_vm15, %v1536_v53, %v1538_v56  ;;  %v1543_v1 = vmul.f32 %v1538_v56, %v2690_v52  ;;  %v2367_v52 = vld [vmem:[%s3282_s1 + $0x7] ss:$8 sm:$0x3] }
 0x38d   : > { %v1542_v57 = vmul.f32 %v1539_v8, %v2665_v27  ;;  %v2366_v27 = vld [vmem:[%s3282_s1 + $0x6] ss:$8 sm:$0x3]  ;;  %v2052_v11 = vperm.slane %v2367_v52, 0  ;;  %v2053_v12 = vperm.slane %v2367_v52, 1 }
 0x38e   : > { %v2026_v9 = vperm.slane %v2366_v27, 0  ;;  %v2027_v13 = vperm.slane %v2366_v27, 1 }
 0x38f   : > { %1658 = vrot.lane.b32.xlu1 %v1656_v24, %s2441_s18  ;;  %1546 = vrot.lane.b32.xlu2 %v1542_v57, %s2437_s26 }
 0x390   : > { %1624 = vrot.lane.b32.xlu0 %v1621_v58, %s2440_s17 }
 0x397   : > { %1572 = vrot.lane.b32.xlu1 %v1570_v55, %s2438_s27  ;;  %1574 = vrot.lane.b32.xlu2 %v1571_v63, %s2438_s27 }
 0x398   : > { %1548 = vrot.lane.b32.xlu0 %v1543_v1, %s2437_s26 }
 0x39f   : > { %2080 = vrot.lane.b32.xlu1 %v2077_v7, %s2437_s26  ;;  %2028 = vrot.lane.b32.xlu2 %v2026_v9, %s2439_s14 }
 0x3a0   : > { %2078 = vrot.lane.b32.xlu0 %v2076_v10, %s2437_s26 }
 0x3a7   : > { %2054 = vrot.lane.b32.xlu1 %v2052_v11, %s2438_s27  ;;  %2056 = vrot.lane.b32.xlu2 %v2053_v12, %s2438_s27 }
 0x3a8   : > { %2030 = vrot.lane.b32.xlu0 %v2027_v13, %s2439_s14 }
 0x3af   : > { %1940 = vrot.lane.b32.xlu1 %v1937_v25, %s2442_s30  ;;  %2004 = vrot.lane.b32.xlu2 %v2002_v18, %s2440_s17 }
 0x3b0   : > { %1938 = vrot.lane.b32.xlu0 %v1936_v19, %s2442_s30 }
 0x3b7   : > { %1888 = vrot.lane.b32.xlu1 %v1886_v21, %s2444_s19  ;;  %1890 = vrot.lane.b32.xlu2 %v1887_v30, %s2444_s19 }
 0x3b8   : > { %2006 = vrot.lane.b32.xlu0 %v2003_v22, %s2440_s17 }
 0x3bf   : > { %1966 = vrot.lane.b32.xlu1 %v1963_v28, %s2441_s18  ;;  %1914 = vrot.lane.b32.xlu2 %v1912_v43, %s2443_s16  ;;  %v1986_v43 = vperm.slane %v3086_v4, 0 }
 0x3c0   : > { %1964 = vrot.lane.b32.xlu0 %v1962_v45, %s2441_s18 }
 0x3c8   : > { %1916 = vrot.lane.b32.xlu0 %v1913_v29, %s2443_s16 }
 0x3c9   : > { %v1735_v32 = vpop.permute.xlu2 %1734 }
 0x3ca   : > { %1740 = vst.msk [vmem:[#allocation2 + $0x48] sm:$0xf] %vm3299_vm7, %v1735_v32  ;;  %vm3303_vm7 = vcmask 920576  }
 0x3ce   : > { %v3088_v36 = vpop.f32.mrf.mxu2 }
 0x3d1   : > { %v1711_v35 = vpop.permute.xlu2 %1710  ;;  %v1750_v29 = vld [vmem:[#allocation2 + $0x48] sm:$0xf] }
 0x3d2   : > { %1716 = vst.msk [vmem:[#allocation2 + $0x38] sm:$0xf0] %vm974_vm10, %v1711_v35 }
 0x3d4   : > { %v3097_v39 = vpop.f32.mrf.mxu3 }
 0x3d9   : > { %v1733_v37 = vpop.permute.xlu0 %1732  ;;  %v3090_v14 = vpop.permute.xlu2 %1660 }
 0x3da   : > { %v1736_v33 = vsel %vm777_vm15, %v1733_v37, %v1735_v32  ;;  %1666 = vst.msk [vmem:[#allocation2 + $0x28] sm:$0xf0] %vm920_vm11, %v3090_v14  ;;  %v1990_v32 = vmul.f32 %v1986_v43, %v2671_v2 }
 0x3db   : > { %1739 = vst [vmem:[#allocation2 + $0x40] sm:$0xf] %v1736_v33 }
 0x3e1   : > { %v1623_v38 = vpop.permute.xlu2 %1622  ;;  %v3099_v41 = vld [vmem:[#allocation2 + $0x28] sm:$0xff] }
 0x3e2   : > { %1629 = vst.msk [vmem:[#allocation2 + $0x10] sm:$0xf0] %vm3302_vm8, %v1623_v38  ;;  %v1427_v44 = vpop.f32.mrf.mxu2  ;;  %v1749_v15 = vld [vmem:[#allocation2 + $0x40] sm:$0xf]  ;;  %vm3305_vm8 = vcmask 1047684  }
 0x3e3   : > { %1999 = vst [vmem:[#allocation2 + $0x28] sm:$0xf] %v1995_v42  ;;  %v1428_v58 = vadd.f32 %v1427_v44, %v2950_v17 }
 0x3e5   : > { %v1462_v63 = vmax.f32 %v1428_v58, 0.0 }
 0x3e7   : > { %v1468_v10 = vmin.f32 %v1462_v63, 6.0 }
 0x3e8   : > { %v1683_v48 = vpop.permute.xlu0 %1682 }
 0x3e9   : > { %v3102_v47 = vpop.permute.xlu2 %1546  ;;  %v1685_v50 = vpop.permute.xlu1 %1684 }
 0x3ea   : > { %1553 = vst.msk [vmem:[#allocation2] sm:$0xf] %vm3301_vm12, %v3102_v47  ;;  %v1686_v51 = vsel %vm834_vm3, %v1683_v48, %v1685_v50  ;;  %v1430_v53 = vpop.f32.mrf.mxu2  ;;  %vm3306_vm12 = vcmask 920576  }
 0x3eb   : > { %1689 = vst [vmem:[#allocation2 + $0x30] sm:$0xf] %v1686_v51  ;;  %v1453_v5 = vpop.f32.mrf.mxu3  ;;  %v1431_v56 = vadd.f32 %v1430_v53, %v2940_v0 }
 0x3ec   : > { %1690 = vst.msk [vmem:[#allocation2 + $0x38] sm:$0xf] %vm3303_vm7, %v1685_v50  ;;  %vm3304_vm7 = vcmask 1043576   ;;  %v1454_v12 = vadd.f32 %v1453_v5, %v2950_v17 }
 0x3ed   : > { %v1464_v3 = vmax.f32 %v1431_v56, 0.0 }
 0x3ee   : > { %v1463_v19 = vmax.f32 %v1454_v12, 0.0 }
 0x3ef   : > { %v1470_v31 = vmin.f32 %v1464_v3, 6.0 }
 0x3f0   : > { %v1469_v45 = vmin.f32 %v1463_v19, 6.0 }
 0x3f1   : > { %v1709_v8 = vpop.permute.xlu1 %1708  ;;  %v1575_v21 = vpop.permute.xlu2 %1574 }
 0x3f2   : > { %v1712_v24 = vsel %vm805_vm2, %v1709_v8, %v1711_v35  ;;  %v1433_v57 = vpop.f32.mrf.mxu2 }
 0x3f3   : > { %1715 = vst [vmem:[#allocation2 + $0x30] sm:$0xf0] %v1712_v24  ;;  %v1434_v59 = vadd.f32 %v1433_v57, %v2936_v62  ;;  %v1456_v61 = vpop.f32.mrf.mxu3  ;;  %v1748_v35 = vld [vmem:[#allocation2 + $0x38] sm:$0xff] }
 0x3f4   : > { %v1457_v7 = vadd.f32 %v1456_v61, %v2940_v0 }
 0x3f5   : > { %v1466_v55 = vmax.f32 %v1434_v59, 0.0 }
 0x3f6   : > { %v1465_v16 = vmax.f32 %v1457_v7, 0.0 }
 0x3f7   : > { %v1472_v1 = vmin.f32 %v1466_v55, 6.0 }
 0x3f8   : > { %v1471_v22 = vmin.f32 %v1465_v16, 6.0 }
 0x3f9   : > { %1487 = vmatpush.msra.mxu0 %v1472_v1  ;;  %v1599_v27 = vpop.permute.xlu1 %1598  ;;  %v3130_v33 = vpop.permute.xlu2 %2028 }
 0x3fa   : > { %v1597_v9 = vpop.permute.xlu0 %1596  ;;  %v1747_v18 = vld [vmem:[#allocation2 + $0x30] sm:$0xff] }
 0x3fb   : > { %1603 = vst.msk [vmem:[#allocation2 + $0x10] sm:$0xf] %vm3304_vm7, %v1597_v9  ;;  %v1600_v52 = vsel %vm846_vm14, %v1597_v9, %v1599_v27  ;;  %v1459_v11 = vpop.f32.mrf.mxu3  ;;  %1488 = vmatpush.msra.mxu0 %v1470_v31 }
 0x3fc   : > { %1604 = vst [vmem:[#allocation2 + $0x18] sm:$0xf] %v1600_v52  ;;  %v1460_v13 = vadd.f32 %v1459_v11, %v2936_v62 }
 0x3fd   : > { %1489 = vmatpush.msra.mxu0 %v1468_v10 }
 0x3fe   : > { %v1467_v25 = vmax.f32 %v1460_v13, 0.0  ;;  %2339 = vmatmul.msk.f32.vlgmr.msra.gmra.mxu0 %vm1112_vm9, %v2971_v46 }
 0x3ff   : > { %2350 = vmatpush.msk.msrb.mxu0 %vm482_vm1, %v1749_v15 }
 0x400   : > { %v1473_v20 = vmin.f32 %v1467_v25, 6.0 }
 0x401   : > { %1769 = vmatpush.msrb.mxu0 %v1747_v18  ;;  %v1659_v30 = vpop.permute.xlu1 %1658 }
 0x402   : > { %1507 = vmatpush.msra.mxu1 %v1473_v20  ;;  %v1625_v34 = vpop.permute.xlu0 %1624  ;;  %v1662_v26 = vsel %vm862_vm5, %v1659_v30, %v3090_v14  ;;  %v1743_v44 = vld [vmem:[#allocation2 + $0x10] sm:$0xff] }
 0x403   : > { %v1626_v28 = vsel %vm876_vm4, %v1623_v38, %v1625_v34  ;;  %1665 = vst [vmem:[#allocation2 + $0x20] sm:$0xf0] %v1662_v26  ;;  %v1994_v38 = vrot.slane %v1990_v32, 4  ;;  %v2035_v34 = vmul.f32 %v3130_v33, %v2671_v2 }
 0x404   : > { %1630 = vst [vmem:[#allocation2 + $0x18] sm:$0xf0] %v1626_v28  ;;  %1508 = vmatpush.msra.mxu1 %v1471_v22 }
 0x405   : > { %v2039_v28 = vrot.slane %v2035_v34, 4 }
 0x406   : > { %1509 = vmatpush.msra.mxu1 %v1469_v45 }
 0x407   : > { %2340 = vmatmul.msk.f32.vlgmr.msra.gmra.mxu1 %vm1112_vm9, %v2971_v46 }
 0x408   : > { %2354 = vmatpush.msk.msrb.mxu1 %vm482_vm1, %v1750_v29 }
 0x409   : > { %v1573_v37 = vpop.permute.xlu1 %1572 }
 0x40a   : > { %1795 = vmatpush.msrb.mxu1 %v1748_v35  ;;  %v1549_v14 = vpop.permute.xlu0 %1548  ;;  %v1576_v6 = vsel %vm425_vm0, %v1573_v37, %v1575_v21  ;;  %1579 = vst.msk [vmem:[#allocation2] sm:$0xf0] %vm3305_vm8, %v1573_v37  ;;  %v1745_v4 = vld [vmem:[#allocation2 + $0x20] sm:$0xff] }
 0x40b   : > { %v1550_v54 = vsel %vm789_vm13, %v3102_v47, %v1549_v14  ;;  %1580 = vst [vmem:[#allocation2 + $0x8] sm:$0xf0] %v1576_v6  ;;  %1770 = vmatpush.msrb.mxu0 %v1745_v4  ;;  %v1744_v42 = vld [vmem:[#allocation2 + $0x18] sm:$0xff]  ;;  %v2057_v47 = vpop.permute.xlu2 %2056  ;;  %v746_v6 = vld [vmem:[%s3292_s11] sm:$0xf] }
 0x40c   : > { %1796 = vmatpush.msrb.mxu1 %v3099_v41  ;;  %1554 = vst [vmem:[#allocation2 + $0x8] sm:$0xf] %v1550_v54 }
 0x40d   : > { %1998 = vst [vmem:[#allocation2 + $0x20] sm:$0xf] %v1994_v38  ;;  %1771 = vmatpush.msrb.mxu0 %v1743_v44 }
 0x40e   : > { %1797 = vmatpush.msrb.mxu1 %v1744_v42 }
 0x411   : > { %v2081_v48 = vpop.permute.xlu1 %2080  ;;  %v1741_v50 = vld [vmem:[#allocation2] sm:$0xff] }
 0x412   : > { %v2079_v51 = vpop.permute.xlu0 %2078  ;;  %1772 = vmatpush.msrb.mxu0 %v1741_v50 }
 0x413   : > { %2351 = vmatmul.msk.f32.vlgmr.msrb.gmra.mxu0 %vm1027_vm6, %v2828_v40  ;;  %v1742_v53 = vld [vmem:[#allocation2 + $0x8] sm:$0xff]  ;;  %v2005_v57 = vpop.permute.xlu2 %2004  ;;  %v2082_v13 = vsel %vm789_vm13, %v2079_v51, %v2081_v48  ;;  %v2085_v15 = vmul.f32 %v2079_v51, %v2671_v2 }
 0x414   : > { %1798 = vmatpush.msrb.mxu1 %v1742_v53  ;;  %v2011_v58 = vmul.f32 %v2005_v57, %v2671_v2  ;;  %v2086_v16 = vmul.f32 %v2082_v13, %v2701_v60 }
 0x415   : > { %2355 = vmatmul.msk.f32.vlgmr.msrb.gmra.mxu1 %vm1027_vm6, %v2828_v40  ;;  %v2089_v18 = vrot.slane %v2085_v15, 4 }
 0x416   : > { %v2090_v21 = vrot.slane %v2086_v16, 4 }
 0x419   : > { %v2055_v41 = vpop.permute.xlu1 %2054 }
 0x41a   : > { %v2031_v5 = vpop.permute.xlu0 %2030  ;;  %v2058_v56 = vsel %vm425_vm0, %v2055_v41, %v2057_v47  ;;  %v2061_v8 = vmul.f32 %v2055_v41, %v2671_v2 }
 0x41b   : > { %v2062_v24 = vmul.f32 %v2058_v56, %v2701_v60  ;;  %2352 = vmatmul.msk.f32.gmra.mxu0 %vm1027_vm6, %v2835_v49  ;;  %v2032_v61 = vsel %vm846_vm14, %v3130_v33, %v2031_v5  ;;  %v1891_v7 = vpop.permute.xlu2 %1890 }
 0x41c   : > { %2065 = vrot.lane.b32.xlu0 %v2061_v8, %s2443_s16  ;;  %v1896_v37 = vmul.f32 %v1891_v7, %v2701_v60 }
 0x41d   : > { %2356 = vmatmul.msk.f32.gmra.mxu1 %vm1027_vm6, %v2835_v49  ;;  %2067 = vrot.lane.b32.xlu1 %v2062_v24, %s2443_s16  ;;  %v2036_v49 = vmul.f32 %v2032_v61, %v2701_v60 }
 0x41e   : > { %v1900_v14 = vrot.slane %v1896_v37, 4 }
 0x41f   : > { %v2040_v55 = vrot.slane %v2036_v49, 4 }
 0x421   : > { %v1941_v40 = vpop.permute.xlu1 %1940 }
 0x422   : > { %v1939_v59 = vpop.permute.xlu0 %1938  ;;  %v1946_v27 = vmul.f32 %v1941_v40, %v2701_v60 }
 0x423   : > { %2353 = vmatmul.msk.f32.gmra.mxu0 %vm1027_vm6, %v2848_v23  ;;  %v1915_v25 = vpop.permute.xlu2 %1914  ;;  %v1942_v43 = vsel %vm834_vm3, %v1939_v59, %v1941_v40 }
 0x424   : > { %2015 = vrot.lane.b32.xlu0 %v2011_v58, %s2441_s18  ;;  %v1950_v10 = vrot.slane %v1946_v27, 4  ;;  %v1945_v29 = vmul.f32 %v1942_v43, %v2671_v2 }
 0x425   : > { %2357 = vmatmul.msk.f32.gmra.mxu1 %vm1027_vm6, %v2848_v23 }
 0x426   : > { %v1949_v32 = vrot.slane %v1945_v29, 4 }
 0x429   : > { %v1889_v3 = vpop.permute.xlu1 %1888 }
 0x42a   : > { %v2007_v63 = vpop.permute.xlu0 %2006  ;;  %v1892_v22 = vsel %vm777_vm15, %v1889_v3, %v1891_v7 }
 0x42b   : > { %v2008_v1 = vsel %vm876_vm4, %v2005_v57, %v2007_v63  ;;  %v1895_v26 = vmul.f32 %v1892_v22, %v2671_v2 }
 0x42c   : > { %v2012_v31 = vmul.f32 %v2008_v1, %v2701_v60  ;;  %2043 = vrot.lane.b32.xlu0 %v2040_v55, %s2442_s30 }
 0x42d   : > { %v1899_v45 = vrot.slane %v1895_v26, 4 }
 0x42e   : > { %2017 = vrot.lane.b32.xlu1 %v2012_v31, %s2441_s18 }
 0x431   : > { %v1967_v9 = vpop.permute.xlu1 %1966 }
 0x432   : > { %v1965_v52 = vpop.permute.xlu0 %1964  ;;  %v1972_v23 = vmul.f32 %v1967_v9, %v2701_v60 }
 0x433   : > { %v1968_v11 = vsel %vm862_vm5, %v1965_v52, %v1967_v9 }
 0x434   : > { %v1971_v12 = vmul.f32 %v1968_v11, %v2671_v2  ;;  %1953 = vrot.lane.b32.xlu0 %v1950_v10, %s2439_s14  ;;  %1977 = vrot.lane.b32.xlu2 %v1972_v23, %s2440_s17 }
 0x436   : > { %1975 = vrot.lane.b32.xlu1 %v1971_v12, %s2440_s17 }
 0x43a   : > { %v1917_v19 = vpop.permute.xlu0 %1916 }
 0x43b   : > { %v1918_v20 = vsel %vm805_vm2, %v1915_v25, %v1917_v19  ;;  %v1922_v35 = vmul.f32 %v1917_v19, %v2701_v60 }
 0x43c   : > { %v1921_v30 = vmul.f32 %v1918_v20, %v2671_v2  ;;  %2091 = vrot.lane.b32.xlu2 %v2089_v18, %s2444_s19 }
 0x43e   : > { %1925 = vrot.lane.b32.xlu0 %v1921_v30, %s2438_s27  ;;  %2093 = vrot.lane.b32.xlu1 %v2090_v21, %s2444_s19 }
 0x444   : > { %2041 = vrot.lane.b32.xlu2 %v2039_v28, %s2442_s30 }
 0x446   : > { %1901 = vrot.lane.b32.xlu1 %v1899_v45, %s2437_s26 }
 0x44c   : > { %1951 = vrot.lane.b32.xlu2 %v1949_v32, %s2439_s14  ;;  %s3236_s14 = scalar_lea.vmem %s3293_s12, %s2382_s25 }
 0x44e   : > { %1927 = vrot.lane.b32.xlu1 %v1922_v35, %s2438_s27 }
 0x454   : > { %1903 = vrot.lane.b32.xlu2 %v1900_v14, %s2437_s26 }
 0x45c   : > { %1109 = vperm.xlu2 %2404, %v746_v6  }
 0x47b   : > { %v3192_v2 = vpop.f32.mrf.mxu0 }
 0x484   : > { %v3194_v4 = vpop.f32.mrf.mxu1 }
 0x48e   : > { %v2066_v33 = vpop.permute.xlu0 %2065  ;;  %v1978_v54 = vpop.permute.xlu2 %1977 }
 0x48f   : > { %v2068_v38 = vpop.permute.xlu1 %2067 }
 0x490   : > { %v2069_v42 = vsel %vm805_vm2, %v2066_v33, %v2068_v38  ;;  %2073 = vst.msk [vmem:[#allocation2 + $0x38] sm:$0xf0] %vm974_vm10, %v2068_v38  ;;  %v1774_v60 = vpop.f32.mrf.mxu0 }
 0x491   : > { %2072 = vst [vmem:[#allocation2 + $0x30] sm:$0xf0] %v2069_v42  ;;  %v1775_v57 = vadd.f32 %v1774_v60, %v2950_v17 }
 0x492   : > { %v1800_v44 = vpop.f32.mrf.mxu1 }
 0x493   : > { %v1801_v49 = vadd.f32 %v1800_v44, %v2950_v17  ;;  %v1809_v1 = vmax.f32 %v1775_v57, 0.0 }
 0x495   : > { %v1810_v52 = vmax.f32 %v1801_v49, 0.0  ;;  %v1815_v15 = vmin.f32 %v1809_v1, 6.0 }
 0x496   : > { %v2016_v48 = vpop.permute.xlu0 %2015  ;;  %v2092_v50 = vpop.permute.xlu2 %2091 }
 0x497   : > { %v1816_v18 = vmin.f32 %v1810_v52, 6.0 }
 0x498   : > { %v1777_v51 = vpop.f32.mrf.mxu0 }
 0x499   : > { %v1778_v5 = vadd.f32 %v1777_v51, %v2940_v0  ;;  %v2426_v51 = vld [vmem:[%s3289_s8 + $0x8] sm:$0xff] }
 0x49a   : > { %v1803_v53 = vpop.f32.mrf.mxu1 }
 0x49b   : > { %v1804_v40 = vadd.f32 %v1803_v53, %v2940_v0  ;;  %v1811_v3 = vmax.f32 %v1778_v5, 0.0  ;;  %v2427_v53 = vld [vmem:[%s3289_s8 + $0x10] sm:$0xff] }
 0x49d   : > { %v1812_v31 = vmax.f32 %v1804_v40, 0.0  ;;  %v1817_v23 = vmin.f32 %v1811_v3, 6.0 }
 0x49e   : > { %v2044_v47 = vpop.permute.xlu0 %2043  ;;  %v2042_v41 = vpop.permute.xlu2 %2041 }
 0x49f   : > { %2049 = vst.msk [vmem:[#allocation2 + $0x38] sm:$0xf] %vm3306_vm12, %v2044_v47  ;;  %v2045_v56 = vsel %vm834_vm3, %v2042_v41, %v2044_v47  ;;  %vm3307_vm3 = vmmov %vm3304_vm7  ;;  %v1818_v16 = vmin.f32 %v1812_v31, 6.0 }
 0x4a0   : > { %2048 = vst [vmem:[#allocation2 + $0x30] sm:$0xf] %v2045_v56  ;;  %v2018_v8 = vpop.permute.xlu1 %2017  ;;  %v1780_v24 = vpop.f32.mrf.mxu0 }
 0x4a1   : > { %v2019_v58 = vsel %vm862_vm5, %v2016_v48, %v2018_v8  ;;  %2023 = vst.msk [vmem:[#allocation2 + $0x28] sm:$0xf0] %vm920_vm11, %v2018_v8  ;;  %v1781_v59 = vadd.f32 %v1780_v24, %v2936_v62  ;;  %vm3308_vm5 = vcmask 1047564   ;;  %v2425_v48 = vld [vmem:[%s3289_s8] sm:$0xff] }
 0x4a2   : > { %2022 = vst [vmem:[#allocation2 + $0x20] sm:$0xf0] %v2019_v58  ;;  %v1806_v61 = vpop.f32.mrf.mxu1 }
 0x4a3   : > { %v1813_v55 = vmax.f32 %v1781_v59, 0.0  ;;  %v1807_v63 = vadd.f32 %v1806_v61, %v2936_v62 }
 0x4a5   : > { %v1819_v27 = vmin.f32 %v1813_v55, 6.0  ;;  %v1814_v7 = vmax.f32 %v1807_v63, 0.0 }
 0x4a6   : > { %v1954_v9 = vpop.permute.xlu0 %1953  ;;  %v1952_v10 = vpop.permute.xlu2 %1951 }
 0x4a7   : > { %v1820_v11 = vmin.f32 %v1814_v7, 6.0  ;;  %v1955_v12 = vsel %vm846_vm14, %v1952_v10, %v1954_v9  ;;  %1958 = vst.msk [vmem:[#allocation2 + $0x10] sm:$0xf] %vm3307_vm3, %v1952_v10  ;;  %1834 = vmatpush.msra.mxu2 %v1819_v27  ;;  %vm3309_vm14 = vmmov %vm3305_vm8 }
 0x4a8   : > { %1959 = vst [vmem:[#allocation2 + $0x18] sm:$0xf] %v1955_v12  ;;  %v1976_v13 = vpop.permute.xlu1 %1975  ;;  %v2105_v33 = vld [vmem:[#allocation2 + $0x28] sm:$0xff] }
 0x4a9   : > { %v1979_v25 = vsel %vm876_vm4, %v1976_v13, %v1978_v54  ;;  %1982 = vst.msk [vmem:[#allocation2 + $0x10] sm:$0xf0] %vm3308_vm5, %v1976_v13  ;;  %1854 = vmatpush.msra.mxu3 %v1820_v11  ;;  %1835 = vmatpush.msra.mxu2 %v1817_v23  ;;  %vm3310_vm4 = vcmask 904192  }
 0x4aa   : > { %1983 = vst [vmem:[#allocation2 + $0x18] sm:$0xf0] %v1979_v25 }
 0x4ab   : > { %1855 = vmatpush.msra.mxu3 %v1818_v16  ;;  %1836 = vmatpush.msra.mxu2 %v1815_v15 }
 0x4ac   : > { %2358 = vmatmul.msk.f32.vlgmr.msra.gmra.mxu2 %vm1112_vm9, %v2971_v46 }
 0x4ad   : > { %1856 = vmatpush.msra.mxu3 %v1816_v18 }
 0x4ae   : > { %v1904_v19 = vpop.permute.xlu2 %1903  ;;  %2359 = vmatmul.msk.f32.vlgmr.msra.gmra.mxu3 %vm1112_vm9, %v2971_v46 }
 0x4b0   : > { %v1926_v20 = vpop.permute.xlu0 %1925  ;;  %v2094_v21 = vpop.permute.xlu1 %2093  ;;  %v2102_v54 = vld [vmem:[#allocation2 + $0x10] sm:$0xff] }
 0x4b1   : > { %1932 = vst.msk [vmem:[#allocation2] sm:$0xf0] %vm3309_vm14, %v1926_v20  ;;  %v2095_v30 = vsel %vm777_vm15, %v2092_v50, %v2094_v21  ;;  %vm3311_vm15 = vcmask 1043592   ;;  %v2103_v38 = vld [vmem:[#allocation2 + $0x18] sm:$0xff] }
 0x4b2   : > { %2098 = vst [vmem:[#allocation2 + $0x40] sm:$0xf] %v2095_v30 }
 0x4b3   : > { %2099 = vst.msk [vmem:[#allocation2 + $0x48] sm:$0xf] %vm3310_vm4, %v2094_v21 }
 0x4b6   : > { %v3219_v22 = vpop.permute.xlu2 %1109 }
 0x4b7   : > { %v1154_v34 = vadd.f32 %v3097_v39, %v3219_v22  ;;  %v1512_v26 = vadd.f32 %v3194_v4, %v3219_v22  ;;  %v1134_v28 = vadd.f32 %v3088_v36, %v3219_v22  ;;  %v1492_v29 = vadd.f32 %v3192_v2, %v3219_v22  ;;  %v2106_v39 = vld [vmem:[#allocation2 + $0x30] sm:$0xff]  ;;  %v2107_v2 = vld [vmem:[#allocation2 + $0x38] sm:$0xff]  ;;  %v2104_v4 = vld [vmem:[#allocation2 + $0x20] sm:$0xff] }
 0x4b8   : > { %v1902_v43 = vpop.permute.xlu1 %1901 }
 0x4b9   : > { %v1158_v45 = vrot.slane %v1154_v34, 4  ;;  %v1516_v32 = vrot.slane %v1512_v26, 4  ;;  %v1905_v35 = vsel %vm789_vm13, %v1902_v43, %v1904_v19  ;;  %1908 = vst.msk [vmem:[#allocation2] sm:$0xf] %vm3311_vm15, %v1902_v43  ;;  %v2108_v37 = vld [vmem:[#allocation2 + $0x40] sm:$0xf] }
 0x4ba   : > { %1909 = vst [vmem:[#allocation2 + $0x8] sm:$0xf] %v1905_v35  ;;  %v2109_v36 = vld [vmem:[#allocation2 + $0x48] sm:$0xf]  ;;  %2369 = vmatpush.msk.msrb.mxu2 %vm482_vm1, %v2108_v37 }
 0x4bb   : > { %2373 = vmatpush.msk.msrb.mxu3 %vm482_vm1, %v2109_v36  ;;  %v1159_v14 = vsel %vm482_vm1, %v1134_v28, %v1158_v45  ;;  %v1517_v6 = vsel %vm482_vm1, %v1492_v29, %v1516_v32 }
 0x4bc   : > { %2128 = vmatpush.msrb.mxu2 %v2106_v39  ;;  %1161 = vst [vmem:[%s3236_s14] sm:$0xff] %v1159_v14 }
 0x4bd   : > { %2154 = vmatpush.msrb.mxu3 %v2107_v2  ;;  %2341 = vst [vmem:[%s3236_s14 + $0x8] sm:$0xff] %v1517_v6 }
 0x4be   : > { %2129 = vmatpush.msrb.mxu2 %v2104_v4 }
 0x4bf   : > { %2155 = vmatpush.msrb.mxu3 %v2105_v33 }
 0x4c0   : > { %2130 = vmatpush.msrb.mxu2 %v2102_v54  ;;  %v1928_v42 = vpop.permute.xlu1 %1927  ;;  %v2100_v60 = vld [vmem:[#allocation2] sm:$0xff] }
 0x4c1   : > { %2156 = vmatpush.msrb.mxu3 %v2103_v38  ;;  %v1929_v44 = vsel %vm425_vm0, %v1926_v20, %v1928_v42 }
 0x4c2   : > { %1933 = vst [vmem:[#allocation2 + $0x8] sm:$0xf0] %v1929_v44  ;;  %2131 = vmatpush.msrb.mxu2 %v2100_v60 }
 0x4c3   : > { %2370 = vmatmul.msk.f32.vlgmr.msrb.gmra.mxu2 %vm1027_vm6, %v2425_v48 }
 0x4c9   : > { %v2101_v50 = vld [vmem:[#allocation2 + $0x8] sm:$0xff] }
 0x4ca   : > { %2157 = vmatpush.msrb.mxu3 %v2101_v50 }
 0x4cb   : > { %2371 = vmatmul.msk.f32.gmra.mxu2 %vm1027_vm6, %v2426_v51  ;;  %2374 = vmatmul.msk.f32.vlgmr.msrb.gmra.mxu3 %vm1027_vm6, %v2425_v48 }
 0x4d3   : > { %2372 = vmatmul.msk.f32.gmra.mxu2 %vm1027_vm6, %v2427_v53  ;;  %2375 = vmatmul.msk.f32.gmra.mxu3 %vm1027_vm6, %v2426_v51 }
 0x4db   : > { %2376 = vmatmul.msk.f32.gmra.mxu3 %vm1027_vm6, %v2427_v53 }
 0x52f   : > { %v1838_v47 = vpop.f32.mrf.mxu2 }
 0x530   : > { %v1839_v5 = vadd.f32 %v1838_v47, %v3219_v22 }
 0x531   : > { %v1858_v41 = vpop.f32.mrf.mxu3 }
 0x532   : > { %v1859_v56 = vadd.f32 %v1858_v41, %v3219_v22 }
 0x534   : > { %v1863_v8 = vrot.slane %v1859_v56, 4 }
 0x536   : > { %v1864_v24 = vsel %vm482_vm1, %v1839_v5, %v1863_v8 }
 0x537   : > { %2360 = vst [vmem:[%s3236_s14 + $0x10] sm:$0xff] %v1864_v24 }
 0x546   : > { %v2133_v57 = vpop.f32.mrf.mxu2 }
 0x547   : > { %v2134_v3 = vadd.f32 %v2133_v57, %v2950_v17 }
 0x549   : > { %v2168_v31 = vmax.f32 %v2134_v3, 0.0 }
 0x54b   : > { %v2174_v52 = vmin.f32 %v2168_v31, 6.0 }
 0x54e   : > { %v2136_v40 = vpop.f32.mrf.mxu2  ;;  %v2159_v58 = vpop.f32.mrf.mxu3 }
 0x54f   : > { %v2137_v59 = vadd.f32 %v2136_v40, %v2940_v0  ;;  %v2160_v23 = vadd.f32 %v2159_v58, %v2950_v17 }
 0x551   : > { %v2170_v63 = vmax.f32 %v2137_v59, 0.0  ;;  %v2169_v15 = vmax.f32 %v2160_v23, 0.0 }
 0x553   : > { %v2176_v7 = vmin.f32 %v2170_v63, 6.0 }
 0x556   : > { %v2139_v61 = vpop.f32.mrf.mxu2  ;;  %v2162_v49 = vpop.f32.mrf.mxu3 }
 0x557   : > { %v2140_v55 = vadd.f32 %v2139_v61, %v2936_v62  ;;  %v2163_v9 = vadd.f32 %v2162_v49, %v2940_v0  ;;  %v2175_v0 = vmin.f32 %v2169_v15, 6.0 }
 0x559   : > { %v2172_v1 = vmax.f32 %v2140_v55, 0.0  ;;  %v2171_v12 = vmax.f32 %v2163_v9, 0.0 }
 0x55b   : > { %v2178_v27 = vmin.f32 %v2172_v1, 6.0  ;;  %v2177_v25 = vmin.f32 %v2171_v12, 6.0 }
 0x55d   : > { %2193 = vmatpush.msra.mxu0 %v2178_v27 }
 0x55e   : > { %v2165_v10 = vpop.f32.mrf.mxu3 }
 0x55f   : > { %v2166_v11 = vadd.f32 %v2165_v10, %v2936_v62  ;;  %2194 = vmatpush.msra.mxu0 %v2176_v7 }
 0x561   : > { %v2173_v13 = vmax.f32 %v2166_v11, 0.0  ;;  %2195 = vmatpush.msra.mxu0 %v2174_v52 }
 0x562   : > { %2377 = vmatmul.msk.f32.vlgmr.msra.gmra.mxu0 %vm1112_vm9, %v2971_v46 }
 0x563   : > { %v2179_v16 = vmin.f32 %v2173_v13, 6.0 }
 0x565   : > { %2213 = vmatpush.msra.mxu1 %v2179_v16 }
 0x567   : > { %2214 = vmatpush.msra.mxu1 %v2177_v25 }
 0x569   : > { %2215 = vmatpush.msra.mxu1 %v2175_v0 }
 0x56a   : > { %2378 = vmatmul.msk.f32.vlgmr.msra.gmra.mxu1 %vm1112_vm9, %v2971_v46 }
 0x5df   : > { %v2197_v62 = vpop.f32.mrf.mxu0 }
 0x5e0   : > { %v2198_v20 = vadd.f32 %v2197_v62, %v3219_v22 }
 0x5e7   : > { %v2217_v17 = vpop.f32.mrf.mxu1 }
 0x5e8   : > { %v2218_v18 = vadd.f32 %v2217_v17, %v3219_v22 }
 0x5ea   : > { %v2222_v19 = vrot.slane %v2218_v18, 4 }
 0x5ec   : > { %v2223_v21 = vsel %vm482_vm1, %v2198_v20, %v2222_v19 }
 0x5ed   : > { %2379 = vst [vmem:[%s3236_s14 + $0x18] sm:$0xff] %v2223_v21 }
 0x5ee PF: > { %s22_s21 = sadd.s32 1, %s2434_s21  }
 0x5ef   : > { %p19_p4 = scmp.ge.s32.totalorder %s22_s21, 4  }
 0x5f1   :  { %21 = sbr.rel (!%p19_p4) target bundleno = 1 (0x1), region = 109 }

</bundles_post_ra>
